<compile_context>
chip_gen: v5e
topology: v5e:2x2
jax: 0.10.0
libtpu: 0.0.40
codegen_flags: <defaults>
</compile_context>

<pallas_src>
import functools
import numpy as np

import jax
import jax.numpy as jnp
from jax import lax
from jax.experimental import pallas as pl
from jax.experimental.pallas import tpu as pltpu


def _cdiv(a, b):
    return -(-a // b)


# ----------------------------------------------------------------------------
# Host glue: 4-tap bicubic warp (align_corners=True, a=-0.75), banded packing.
# ----------------------------------------------------------------------------
def _segment_taps(out_len, in_len, col_offset):
    """Vectorized 1-D bicubic taps: (out_len, 4) source columns + weights."""
    if out_len <= 0:
        return np.zeros((0, 4), np.int64), np.zeros((0, 4), np.float32)
    if in_len <= 1:
        cols = np.full((out_len, 4), col_offset, dtype=np.int64)
        wgts = np.zeros((out_len, 4), dtype=np.float32)
        wgts[:, 1] = 1.0
        return cols, wgts
    idx = np.arange(out_len, dtype=np.float64)
    if out_len == 1:
        s = np.zeros(1, dtype=np.float64)
    else:
        s = idx * (in_len - 1) / (out_len - 1)
    i0 = np.floor(s).astype(np.int64)
    frac = s - i0
    a = -0.75
    offs = np.array([-1.0, 0.0, 1.0, 2.0])
    t = np.abs(frac[:, None] - offs[None, :])
    w_near = ((a + 2.0) * t - (a + 3.0)) * t * t + 1.0          # |t| <= 1
    w_far = ((a * t - 5.0 * a) * t + 8.0 * a) * t - 4.0 * a     # 1 < |t| < 2
    wgts = np.where(t <= 1.0, w_near,
                    np.where(t < 2.0, w_far, 0.0)).astype(np.float32)
    cols = np.clip(i0[:, None] + np.array([-1, 0, 1, 2]), 0, in_len - 1)
    return (cols + col_offset).astype(np.int64), wgts


def _build_warp_taps(T, window, time_warp, seed):
    """Per output row: 4 source rows + weights (identity if warp disabled)."""
    if (not time_warp) or (T - window <= window):
        cols = np.tile(np.arange(T, dtype=np.int64)[:, None], (1, 4))
        wgts = np.zeros((T, 4), dtype=np.float32)
        wgts[:, 1] = 1.0
        return cols, wgts
    rng = np.random.default_rng(seed)
    c = int(rng.integers(window, T - window))          # torch.randint(window, T-window)
    w = int(rng.integers(c - window, c + window)) + 1  # torch.randint(c-w, c+w) + 1
    lc, lw = _segment_taps(w, c, 0)                    # left:  rows [0, w) <- cols [0, c)
    rc, rw = _segment_taps(T - w, T - c, c)            # right: rows [w, T) <- cols [c, T)
    return np.concatenate([lc, rc], 0), np.concatenate([lw, rw], 0)


def _pack_banded(cols, wgts, T_pad, TM, TK):
    """Pack taps into banded block storage Wb + per-tile K-block offsets."""
    T = cols.shape[0]
    n_tiles = T_pad // TM
    nkb = T_pad // TK
    pc = np.zeros((T_pad, 4), dtype=np.int64)
    pw = np.zeros((T_pad, 4), dtype=np.float32)
    pc[:T] = cols
    pw[:T] = wgts
    pc = pc.reshape(n_tiles, TM, 4)
    pw = pw.reshape(n_tiles, TM, 4)

    valid = pw != 0.0
    big = np.where(valid, pc, np.iinfo(np.int64).max)
    small = np.where(valid, pc, -1)
    minc = np.clip(big.min(axis=(1, 2)), 0, T_pad - 1)
    maxc = np.clip(small.max(axis=(1, 2)), 0, T_pad - 1)
    klo_raw = minc // TK
    khi_raw = maxc // TK
    KB = int(np.max(khi_raw - klo_raw)) + 1
    klo = np.minimum(klo_raw, nkb - KB).astype(np.int32)

    Wb = np.zeros((n_tiles, TM, KB * TK), dtype=np.float32)
    rel = np.clip(pc - klo.astype(np.int64)[:, None, None] * TK, 0, KB * TK - 1)
    ti = np.broadcast_to(np.arange(n_tiles)[:, None, None], pc.shape)
    ri = np.broadcast_to(np.arange(TM)[None, :, None], pc.shape)
    np.add.at(Wb, (ti, ri, rel), pw)   # duplicates from border clipping sum up
    return Wb, klo, KB


@functools.lru_cache(maxsize=8)
def _prepare_warp(T, T_pad, TM, TK, window, time_warp, seed):
    """Memoized host-side tap building + banded packing (pure numpy)."""
    cols, wgts = _build_warp_taps(T, window, time_warp, seed)
    return _pack_banded(cols, wgts, T_pad, TM, TK)


# ----------------------------------------------------------------------------
# Pallas kernel: fused banded time-warp matmul (bf16 MXU, f32 vreg acc)
# + rank-1 masking, Bblk batch items per grid step.
# ----------------------------------------------------------------------------
def _spec_augment_kernel(klo_ref, fpos_ref, flen_ref, tpos_ref, tlen_ref,
                         wb_ref, *refs, KB, TM, TK, F_pad, Bblk,
                         n_freq_mask, n_time_mask):
    del klo_ref                      # only consumed by the x index_maps
    x_refs = refs[:KB]
    o_ref = refs[KB]
    i = pl.program_id(0)             # time tile (outer)
    bg = pl.program_id(1)            # batch group (inner -> Wb DMA elided)

    # Banded warp weights for this time tile: loaded once, reused for all
    # Bblk batch items (stays in vregs across the unrolled loop).
    wb = wb_ref[...]                                        # (TM, KB*TK) bf16
    wb_parts = [wb[:, kk * TK:(kk + 1) * TK] for kk in range(KB)]

    # rank-1 index vectors shared by every batch item in the block
    f_idx = lax.broadcasted_iota(jnp.int32, (1, F_pad), 1)
    t_idx = i * TM + lax.broadcasted_iota(jnp.int32, (TM, 1), 0)

    for bb in range(Bblk):           # unrolled loop of dots reusing wb vregs
        b = bg * Bblk + bb
        # Fused KB-band contraction: (TM,TK) bf16 @ (TK,F) bf16 -> f32 vregs.
        acc = jnp.dot(wb_parts[0], x_refs[0][bb].astype(jnp.bfloat16),
                      preferred_element_type=jnp.float32)
        for kk in range(1, KB):
            acc = acc + jnp.dot(wb_parts[kk],
                                x_refs[kk][bb].astype(jnp.bfloat16),
                                preferred_element_type=jnp.float32)

        # freq masks (dim=2): rank-1 (1, F)
        fmask = jnp.zeros((1, F_pad), dtype=jnp.bool_)
        for n in range(n_freq_mask):
            pos = fpos_ref[b, n]
            ln = flen_ref[b, n]
            fmask = fmask | ((pos <= f_idx) & (f_idx < pos + ln))
        # time masks (dim=1): rank-1 (TM, 1), absolute time index
        tmask = jnp.zeros((TM, 1), dtype=jnp.bool_)
        for n in range(n_time_mask):
            pos = tpos_ref[b, n]
            ln = tlen_ref[b, n]
            tmask = tmask | ((pos <= t_idx) & (t_idx < pos + ln))

        # replace_with_zero=True
        # TODO(synk): replace_with_zero=False (fill with global mean) not implemented.
        o_ref[bb] = jnp.where(fmask | tmask, jnp.float32(0.0),
                              acc).astype(o_ref.dtype)


# ----------------------------------------------------------------------------
# Wrapper.
# ----------------------------------------------------------------------------
def spec_augment(x, key, *, warp_seed=0,
                 time_warp=True, time_warp_window=5,
                 freq_mask=True, freq_mask_width=(0, 10), n_freq_mask=2,
                 time_mask=True, time_mask_width=(0, 50), n_time_mask=2,
                 tile_t=128, batch_block=None):
    B, T, F = x.shape
    out_dtype = x.dtype
    TM = TK = tile_t
    T_pad = TM * _cdiv(T, TM)
    F_pad = 128 * _cdiv(F, 128)   # lane-dense output

    # Batch-blocking: fatten per-step HBM traffic (x reads + out writes
    # ~0.5-1 MiB/step at F_pad=128) while keeping the unrolled loop's vreg
    # pressure modest.  VMEM use stays ~2 MiB (double-buffered) -- far under
    # the scoped default on v5e/v6e/v7x.
    if batch_block is None:
        batch_block = max(1, min(B, 4))
    Bblk = batch_block
    B_pad = Bblk * _cdiv(B, Bblk)

    # --- time-warp band (host numpy, memoized; no device<->host sync) ---
    Wb_np, klo_np, KB = _prepare_warp(int(T), int(T_pad), int(TM), int(TK),
                                      int(time_warp_window), bool(time_warp),
                                      int(warp_seed))
    Wb = jnp.asarray(Wb_np, dtype=jnp.bfloat16)
    klo = jnp.asarray(klo_np, dtype=jnp.int32)

    # --- mask draws (on device, traced bounds -> no host sync) ---
    def draw(k, D, width, n, enabled):
        if (not enabled) or n == 0:
            z = jnp.zeros((B, 1), dtype=jnp.int32)
            return z, z, 0
        k_len, k_pos = jax.random.split(k)
        mlen = jax.random.randint(k_len, (B, n), width[0], width[1], dtype=jnp.int32)
        hi = jnp.maximum(1, D - jnp.max(mlen))
        mpos = jax.random.randint(k_pos, (B, n), 0, hi, dtype=jnp.int32)
        return mpos, mlen, n

    k_f, k_t = jax.random.split(key)
    fpos, flen, nf = draw(k_f, F, freq_mask_width, n_freq_mask, freq_mask)
    tpos, tlen, nt = draw(k_t, T, time_mask_width, n_time_mask, time_mask)

    # --- pad to tile-aligned, lane-dense shapes ---
    if B_pad != B:
        bp = ((0, B_pad - B), (0, 0))
        fpos, flen = jnp.pad(fpos, bp), jnp.pad(flen, bp)
        tpos, tlen = jnp.pad(tpos, bp), jnp.pad(tlen, bp)
    if (B_pad, T_pad, F_pad) != (B, T, F):
        x = jnp.pad(x, ((0, B_pad - B), (0, T_pad - T), (0, F_pad - F)))

    n_tiles = T_pad // TM
    n_bgrp = B_pad // Bblk

    kernel = functools.partial(_spec_augment_kernel, KB=KB, TM=TM, TK=TK,
                               F_pad=F_pad, Bblk=Bblk,
                               n_freq_mask=nf, n_time_mask=nt)

    def make_x_map(kk):
        # Band slot kk of x for output tile i, batch group bg.
        def x_map(i, bg, klo_ref, *_):
            return (bg, klo_ref[i] + kk, 0)
        return x_map

    out = pl.pallas_call(
        kernel,
        out_shape=jax.ShapeDtypeStruct((B_pad, T_pad, F_pad), out_dtype),
        grid_spec=pltpu.PrefetchScalarGridSpec(
            num_scalar_prefetch=5,
            # time tiles outer, batch groups inner: Wb's block index only
            # depends on i, so its DMA is elided across consecutive steps.
            grid=(n_tiles, n_bgrp),
            in_specs=[
                # banded warp weights: (n_tiles, TM, KB*TK) bf16
                pl.BlockSpec((pl.Squeezed(), TM, KB * TK),
                             lambda i, bg, *_: (i, 0, 0)),
            ] + [
                # x passed KB times; each copy supplies one 128-row band slot.
                pl.BlockSpec((Bblk, TK, F_pad), make_x_map(kk))
                for kk in range(KB)
            ],
            out_specs=pl.BlockSpec((Bblk, TM, F_pad),
                                   lambda i, bg, *_: (bg, i, 0)),
        ),
        compiler_params=pltpu.CompilerParams(
            dimension_semantics=("parallel", "parallel")),
    )(klo, fpos, flen, tpos, tlen, Wb, *([x] * KB))

    return out[:B, :T, :F]


if __name__ == "__main__":
    key = jax.random.PRNGKey(0)
    k_x, k_aug = jax.random.split(key)

    # Small spectrogram batch (like speechbrain fbanks): (batch=2, time=200, freq=80)
    x = jax.random.normal(k_x, (2, 200, 80), dtype=jnp.float32)

    y = spec_augment(x, k_aug, warp_seed=0)
    y = jax.block_until_ready(y)

    assert y.shape == x.shape and y.dtype == x.dtype
    assert bool(jnp.all(jnp.isfinite(y)))
    print("KERNEL_OK")
</pallas_src>

<mosaic_0001>
module attributes {stable_mosaic.version = 11 : i64} {
  func.func @_spec_augment_kernel(%arg0: i32, %arg1: i32, %arg2: memref<2xi32, #tpu.memory_space<smem>>, %arg3: memref<2x2xi32, #tpu.memory_space<smem>>, %arg4: memref<2x2xi32, #tpu.memory_space<smem>>, %arg5: memref<2x2xi32, #tpu.memory_space<smem>>, %arg6: memref<2x2xi32, #tpu.memory_space<smem>>, %arg7: memref<1x128x256xbf16, #tpu.memory_space<vmem>>, %arg8: memref<2x128x128xf32, #tpu.memory_space<vmem>>, %arg9: memref<2x128x128xf32, #tpu.memory_space<vmem>>, %arg10: memref<2x128x128xf32, #tpu.memory_space<vmem>>) attributes {dimension_semantics = [#tpu.dimension_semantics<parallel>, #tpu.dimension_semantics<parallel>], iteration_bounds = array<i64: 2, 1>, scalar_prefetch = 5 : i64, scratch_operands = 0 : i64, tpu.core_type = #tpu.core_type<tc>, window_params = [{transform_indices = @transform_0, window_bounds = array<i64: 1, 128, 256>}, {transform_indices = @transform_1, window_bounds = array<i64: 2, 128, 128>}, {transform_indices = @transform_2, window_bounds = array<i64: 2, 128, 128>}, {transform_indices = @transform_3, window_bounds = array<i64: 2, 128, 128>}]} {
    %c0 = arith.constant 0 : index
    %c0_0 = arith.constant 0 : index
    %c0_1 = arith.constant 0 : index
    %0 = vector.load %arg7[%c0, %c0_0, %c0_1] : memref<1x128x256xbf16, #tpu.memory_space<vmem>>, vector<1x128x256xbf16>
    %1 = vector.shape_cast %0 : vector<1x128x256xbf16> to vector<128x256xbf16>
    %2 = vector.extract_strided_slice %1 {offsets = [0, 0], sizes = [128, 128], strides = [1, 1]} : vector<128x256xbf16> to vector<128x128xbf16>
    %3 = vector.extract_strided_slice %1 {offsets = [0, 128], sizes = [128, 128], strides = [1, 1]} : vector<128x256xbf16> to vector<128x128xbf16>
    %4 = tpu.iota {dimensions = array<i32: 1>} : vector<1x128xi32>
    %c128_i32 = arith.constant 128 : i32
    %5 = arith.muli %arg0, %c128_i32 : i32
    %6 = tpu.iota {dimensions = array<i32: 0>} : vector<128x1xi32>
    %7 = vector.broadcast %5 : i32 to vector<128x1xi32>
    %8 = arith.addi %7, %6 : vector<128x1xi32>
    %c2_i32 = arith.constant 2 : i32
    %9 = arith.muli %arg1, %c2_i32 : i32
    %c0_i32 = arith.constant 0 : i32
    %10 = arith.addi %9, %c0_i32 : i32
    %c0_2 = arith.constant 0 : index
    %c0_3 = arith.constant 0 : index
    %c0_4 = arith.constant 0 : index
    %11 = vector.load %arg8[%c0_2, %c0_3, %c0_4] : memref<2x128x128xf32, #tpu.memory_space<vmem>>, vector<1x128x128xf32>
    %12 = vector.shape_cast %11 : vector<1x128x128xf32> to vector<128x128xf32>
    %13 = arith.truncf %12 : vector<128x128xf32> to vector<128x128xbf16>
    %cst = arith.constant dense<0.000000e+00> : vector<128x128xf32>
    %14 = tpu.matmul %2, %13, %cst {dimension_numbers = #tpu.dot_dimension_numbers<[1], [0], [0], [1], [0, 0, 1, 1], [], []>} : vector<128x128xbf16>, vector<128x128xbf16>, vector<128x128xf32> -> vector<128x128xf32>
    %c0_5 = arith.constant 0 : index
    %c0_6 = arith.constant 0 : index
    %c0_7 = arith.constant 0 : index
    %15 = vector.load %arg9[%c0_5, %c0_6, %c0_7] : memref<2x128x128xf32, #tpu.memory_space<vmem>>, vector<1x128x128xf32>
    %16 = vector.shape_cast %15 : vector<1x128x128xf32> to vector<128x128xf32>
    %17 = arith.truncf %16 : vector<128x128xf32> to vector<128x128xbf16>
    %cst_8 = arith.constant dense<0.000000e+00> : vector<128x128xf32>
    %18 = tpu.matmul %3, %17, %cst_8 {dimension_numbers = #tpu.dot_dimension_numbers<[1], [0], [0], [1], [0, 0, 1, 1], [], []>} : vector<128x128xbf16>, vector<128x128xbf16>, vector<128x128xf32> -> vector<128x128xf32>
    %19 = arith.addf %14, %18 : vector<128x128xf32>
    %false = arith.constant false
    %20 = vector.broadcast %false : i1 to vector<1x128xi1>
    %21 = arith.index_cast %10 : i32 to index
    %c0_9 = arith.constant 0 : index
    %22 = memref.load %arg3[%21, %c0_9] : memref<2x2xi32, #tpu.memory_space<smem>>
    %23 = arith.index_cast %10 : i32 to index
    %c0_10 = arith.constant 0 : index
    %24 = memref.load %arg4[%23, %c0_10] : memref<2x2xi32, #tpu.memory_space<smem>>
    %25 = vector.broadcast %22 : i32 to vector<1x128xi32>
    %26 = arith.cmpi sle, %25, %4 : vector<1x128xi32>
    %27 = arith.addi %22, %24 : i32
    %28 = vector.broadcast %27 : i32 to vector<1x128xi32>
    %29 = arith.cmpi slt, %4, %28 : vector<1x128xi32>
    %30 = arith.andi %26, %29 : vector<1x128xi1>
    %31 = arith.ori %20, %30 : vector<1x128xi1>
    %32 = arith.index_cast %10 : i32 to index
    %c1 = arith.constant 1 : index
    %33 = memref.load %arg3[%32, %c1] : memref<2x2xi32, #tpu.memory_space<smem>>
    %34 = arith.index_cast %10 : i32 to index
    %c1_11 = arith.constant 1 : index
    %35 = memref.load %arg4[%34, %c1_11] : memref<2x2xi32, #tpu.memory_space<smem>>
    %36 = vector.broadcast %33 : i32 to vector<1x128xi32>
    %37 = arith.cmpi sle, %36, %4 : vector<1x128xi32>
    %38 = arith.addi %33, %35 : i32
    %39 = vector.broadcast %38 : i32 to vector<1x128xi32>
    %40 = arith.cmpi slt, %4, %39 : vector<1x128xi32>
    %41 = arith.andi %37, %40 : vector<1x128xi1>
    %42 = arith.ori %31, %41 : vector<1x128xi1>
    %false_12 = arith.constant false
    %43 = vector.broadcast %false_12 : i1 to vector<128x1xi1>
    %44 = arith.index_cast %10 : i32 to index
    %c0_13 = arith.constant 0 : index
    %45 = memref.load %arg5[%44, %c0_13] : memref<2x2xi32, #tpu.memory_space<smem>>
    %46 = arith.index_cast %10 : i32 to index
    %c0_14 = arith.constant 0 : index
    %47 = memref.load %arg6[%46, %c0_14] : memref<2x2xi32, #tpu.memory_space<smem>>
    %48 = vector.broadcast %45 : i32 to vector<128x1xi32>
    %49 = arith.cmpi sle, %48, %8 : vector<128x1xi32>
    %50 = arith.addi %45, %47 : i32
    %51 = vector.broadcast %50 : i32 to vector<128x1xi32>
    %52 = arith.cmpi slt, %8, %51 : vector<128x1xi32>
    %53 = arith.andi %49, %52 : vector<128x1xi1>
    %54 = arith.ori %43, %53 : vector<128x1xi1>
    %55 = arith.index_cast %10 : i32 to index
    %c1_15 = arith.constant 1 : index
    %56 = memref.load %arg5[%55, %c1_15] : memref<2x2xi32, #tpu.memory_space<smem>>
    %57 = arith.index_cast %10 : i32 to index
    %c1_16 = arith.constant 1 : index
    %58 = memref.load %arg6[%57, %c1_16] : memref<2x2xi32, #tpu.memory_space<smem>>
    %59 = vector.broadcast %56 : i32 to vector<128x1xi32>
    %60 = arith.cmpi sle, %59, %8 : vector<128x1xi32>
    %61 = arith.addi %56, %58 : i32
    %62 = vector.broadcast %61 : i32 to vector<128x1xi32>
    %63 = arith.cmpi slt, %8, %62 : vector<128x1xi32>
    %64 = arith.andi %60, %63 : vector<128x1xi1>
    %65 = arith.ori %54, %64 : vector<128x1xi1>
    %66 = vector.broadcast %42 : vector<1x128xi1> to vector<128x128xi1>
    %67 = vector.broadcast %65 : vector<128x1xi1> to vector<128x128xi1>
    %68 = arith.ori %66, %67 : vector<128x128xi1>
    %cst_17 = arith.constant 0.000000e+00 : f32
    %69 = vector.broadcast %cst_17 : f32 to vector<128x128xf32>
    %70 = arith.select %68, %69, %19 : vector<128x128xi1>, vector<128x128xf32>
    %c0_18 = arith.constant 0 : index
    %c0_19 = arith.constant 0 : index
    %c0_20 = arith.constant 0 : index
    %71 = vector.load %arg10[%c0_18, %c0_19, %c0_20] : memref<2x128x128xf32, #tpu.memory_space<vmem>>, vector<1x128x128xf32>
    %72 = vector.shape_cast %71 : vector<1x128x128xf32> to vector<128x128xf32>
    %73 = vector.shape_cast %70 : vector<128x128xf32> to vector<1x128x128xf32>
    tpu.vector_store %arg10[%c0_18, %c0_19, %c0_20], %73 {strides = array<i32>} : memref<2x128x128xf32, #tpu.memory_space<vmem>>, vector<1x128x128xf32>,
    %c2_i32_21 = arith.constant 2 : i32
    %74 = arith.muli %arg1, %c2_i32_21 : i32
    %c1_i32 = arith.constant 1 : i32
    %75 = arith.addi %74, %c1_i32 : i32
    %c1_22 = arith.constant 1 : index
    %c0_23 = arith.constant 0 : index
    %c0_24 = arith.constant 0 : index
    %76 = vector.load %arg8[%c1_22, %c0_23, %c0_24] : memref<2x128x128xf32, #tpu.memory_space<vmem>>, vector<1x128x128xf32>
    %77 = vector.shape_cast %76 : vector<1x128x128xf32> to vector<128x128xf32>
    %78 = arith.truncf %77 : vector<128x128xf32> to vector<128x128xbf16>
    %cst_25 = arith.constant dense<0.000000e+00> : vector<128x128xf32>
    %79 = tpu.matmul %2, %78, %cst_25 {dimension_numbers = #tpu.dot_dimension_numbers<[1], [0], [0], [1], [0, 0, 1, 1], [], []>} : vector<128x128xbf16>, vector<128x128xbf16>, vector<128x128xf32> -> vector<128x128xf32>
    %c1_26 = arith.constant 1 : index
    %c0_27 = arith.constant 0 : index
    %c0_28 = arith.constant 0 : index
    %80 = vector.load %arg9[%c1_26, %c0_27, %c0_28] : memref<2x128x128xf32, #tpu.memory_space<vmem>>, vector<1x128x128xf32>
    %81 = vector.shape_cast %80 : vector<1x128x128xf32> to vector<128x128xf32>
    %82 = arith.truncf %81 : vector<128x128xf32> to vector<128x128xbf16>
    %cst_29 = arith.constant dense<0.000000e+00> : vector<128x128xf32>
    %83 = tpu.matmul %3, %82, %cst_29 {dimension_numbers = #tpu.dot_dimension_numbers<[1], [0], [0], [1], [0, 0, 1, 1], [], []>} : vector<128x128xbf16>, vector<128x128xbf16>, vector<128x128xf32> -> vector<128x128xf32>
    %84 = arith.addf %79, %83 : vector<128x128xf32>
    %false_30 = arith.constant false
    %85 = vector.broadcast %false_30 : i1 to vector<1x128xi1>
    %86 = arith.index_cast %75 : i32 to index
    %c0_31 = arith.constant 0 : index
    %87 = memref.load %arg3[%86, %c0_31] : memref<2x2xi32, #tpu.memory_space<smem>>
    %88 = arith.index_cast %75 : i32 to index
    %c0_32 = arith.constant 0 : index
    %89 = memref.load %arg4[%88, %c0_32] : memref<2x2xi32, #tpu.memory_space<smem>>
    %90 = vector.broadcast %87 : i32 to vector<1x128xi32>
    %91 = arith.cmpi sle, %90, %4 : vector<1x128xi32>
    %92 = arith.addi %87, %89 : i32
    %93 = vector.broadcast %92 : i32 to vector<1x128xi32>
    %94 = arith.cmpi slt, %4, %93 : vector<1x128xi32>
    %95 = arith.andi %91, %94 : vector<1x128xi1>
    %96 = arith.ori %85, %95 : vector<1x128xi1>
    %97 = arith.index_cast %75 : i32 to index
    %c1_33 = arith.constant 1 : index
    %98 = memref.load %arg3[%97, %c1_33] : memref<2x2xi32, #tpu.memory_space<smem>>
    %99 = arith.index_cast %75 : i32 to index
    %c1_34 = arith.constant 1 : index
    %100 = memref.load %arg4[%99, %c1_34] : memref<2x2xi32, #tpu.memory_space<smem>>
    %101 = vector.broadcast %98 : i32 to vector<1x128xi32>
    %102 = arith.cmpi sle, %101, %4 : vector<1x128xi32>
    %103 = arith.addi %98, %100 : i32
    %104 = vector.broadcast %103 : i32 to vector<1x128xi32>
    %105 = arith.cmpi slt, %4, %104 : vector<1x128xi32>
    %106 = arith.andi %102, %105 : vector<1x128xi1>
    %107 = arith.ori %96, %106 : vector<1x128xi1>
    %false_35 = arith.constant false
    %108 = vector.broadcast %false_35 : i1 to vector<128x1xi1>
    %109 = arith.index_cast %75 : i32 to index
    %c0_36 = arith.constant 0 : index
    %110 = memref.load %arg5[%109, %c0_36] : memref<2x2xi32, #tpu.memory_space<smem>>
    %111 = arith.index_cast %75 : i32 to index
    %c0_37 = arith.constant 0 : index
    %112 = memref.load %arg6[%111, %c0_37] : memref<2x2xi32, #tpu.memory_space<smem>>
    %113 = vector.broadcast %110 : i32 to vector<128x1xi32>
    %114 = arith.cmpi sle, %113, %8 : vector<128x1xi32>
    %115 = arith.addi %110, %112 : i32
    %116 = vector.broadcast %115 : i32 to vector<128x1xi32>
    %117 = arith.cmpi slt, %8, %116 : vector<128x1xi32>
    %118 = arith.andi %114, %117 : vector<128x1xi1>
    %119 = arith.ori %108, %118 : vector<128x1xi1>
    %120 = arith.index_cast %75 : i32 to index
    %c1_38 = arith.constant 1 : index
    %121 = memref.load %arg5[%120, %c1_38] : memref<2x2xi32, #tpu.memory_space<smem>>
    %122 = arith.index_cast %75 : i32 to index
    %c1_39 = arith.constant 1 : index
    %123 = memref.load %arg6[%122, %c1_39] : memref<2x2xi32, #tpu.memory_space<smem>>
    %124 = vector.broadcast %121 : i32 to vector<128x1xi32>
    %125 = arith.cmpi sle, %124, %8 : vector<128x1xi32>
    %126 = arith.addi %121, %123 : i32
    %127 = vector.broadcast %126 : i32 to vector<128x1xi32>
    %128 = arith.cmpi slt, %8, %127 : vector<128x1xi32>
    %129 = arith.andi %125, %128 : vector<128x1xi1>
    %130 = arith.ori %119, %129 : vector<128x1xi1>
    %131 = vector.broadcast %107 : vector<1x128xi1> to vector<128x128xi1>
    %132 = vector.broadcast %130 : vector<128x1xi1> to vector<128x128xi1>
    %133 = arith.ori %131, %132 : vector<128x128xi1>
    %cst_40 = arith.constant 0.000000e+00 : f32
    %134 = vector.broadcast %cst_40 : f32 to vector<128x128xf32>
    %135 = arith.select %133, %134, %84 : vector<128x128xi1>, vector<128x128xf32>
    %c1_41 = arith.constant 1 : index
    %c0_42 = arith.constant 0 : index
    %c0_43 = arith.constant 0 : index
    %136 = vector.load %arg10[%c1_41, %c0_42, %c0_43] : memref<2x128x128xf32, #tpu.memory_space<vmem>>, vector<1x128x128xf32>
    %137 = vector.shape_cast %136 : vector<1x128x128xf32> to vector<128x128xf32>
    %138 = vector.shape_cast %135 : vector<128x128xf32> to vector<1x128x128xf32>
    tpu.vector_store %arg10[%c1_41, %c0_42, %c0_43], %138 {strides = array<i32>} : memref<2x128x128xf32, #tpu.memory_space<vmem>>, vector<1x128x128xf32>,
    return
  }
  func.func @transform_0(%arg0: i32, %arg1: i32, %arg2: memref<2xi32, #tpu.memory_space<smem>>, %arg3: memref<2x2xi32, #tpu.memory_space<smem>>, %arg4: memref<2x2xi32, #tpu.memory_space<smem>>, %arg5: memref<2x2xi32, #tpu.memory_space<smem>>, %arg6: memref<2x2xi32, #tpu.memory_space<smem>>) -> (i32, i32, i32) {
    %c0_i32 = arith.constant 0 : i32
    %c0_i32_0 = arith.constant 0 : i32
    %c0_i32_1 = arith.constant 0 : i32
    return %arg0, %c0_i32, %c0_i32_0 : i32, i32, i32
  }
  func.func @transform_1(%arg0: i32, %arg1: i32, %arg2: memref<2xi32, #tpu.memory_space<smem>>, %arg3: memref<2x2xi32, #tpu.memory_space<smem>>, %arg4: memref<2x2xi32, #tpu.memory_space<smem>>, %arg5: memref<2x2xi32, #tpu.memory_space<smem>>, %arg6: memref<2x2xi32, #tpu.memory_space<smem>>) -> (i32, i32, i32) {
    %0 = arith.index_cast %arg0 : i32 to index
    %1 = memref.load %arg2[%0] : memref<2xi32, #tpu.memory_space<smem>>
    %c0_i32 = arith.constant 0 : i32
    %2 = arith.addi %1, %c0_i32 : i32
    %c0_i32_0 = arith.constant 0 : i32
    %c0_i32_1 = arith.constant 0 : i32
    return %arg1, %2, %c0_i32_0 : i32, i32, i32
  }
  func.func @transform_2(%arg0: i32, %arg1: i32, %arg2: memref<2xi32, #tpu.memory_space<smem>>, %arg3: memref<2x2xi32, #tpu.memory_space<smem>>, %arg4: memref<2x2xi32, #tpu.memory_space<smem>>, %arg5: memref<2x2xi32, #tpu.memory_space<smem>>, %arg6: memref<2x2xi32, #tpu.memory_space<smem>>) -> (i32, i32, i32) {
    %0 = arith.index_cast %arg0 : i32 to index
    %1 = memref.load %arg2[%0] : memref<2xi32, #tpu.memory_space<smem>>
    %c1_i32 = arith.constant 1 : i32
    %2 = arith.addi %1, %c1_i32 : i32
    %c0_i32 = arith.constant 0 : i32
    %c0_i32_0 = arith.constant 0 : i32
    return %arg1, %2, %c0_i32 : i32, i32, i32
  }
  func.func @transform_3(%arg0: i32, %arg1: i32, %arg2: memref<2xi32, #tpu.memory_space<smem>>, %arg3: memref<2x2xi32, #tpu.memory_space<smem>>, %arg4: memref<2x2xi32, #tpu.memory_space<smem>>, %arg5: memref<2x2xi32, #tpu.memory_space<smem>>, %arg6: memref<2x2xi32, #tpu.memory_space<smem>>) -> (i32, i32, i32) {
    %c0_i32 = arith.constant 0 : i32
    %c0_i32_0 = arith.constant 0 : i32
    return %arg1, %arg0, %c0_i32 : i32, i32, i32
  }
}

</mosaic_0001>

<bundles_post_ra>
// kernel: tpu_custom_call.1
= control target key start
LH: loop header
LB: loop body
LE: loop exit
PB: predicated region body
PF: predicated region fallthrough
CT: control target
= control target key end

     0   :  { %s1982_s11 = smov [#allocation3]   ;;  %s1983_s12 = smov [#allocation4]   ;;  %s3418_s0 = inlined_call_operand.hbm [shape: s32[2], index: 0, kind: input, shape index: {}]   ;;  %s3419_s5 = inlined_call_operand.hbm [shape: bf16[2,128,256], index: 5, kind: input, shape index: {}]   ;;  %s3420_s6 = inlined_call_operand.hbm [shape: f32[2,256,128], index: 6, kind: input, shape index: {}]   ;;  %s3421_s7 = inlined_call_operand.hbm [shape: f32[2,256,128], index: 7, kind: input, shape index: {}]   ;;  %s3422_s8 = inlined_call_operand.hbm [shape: f32[2,256,128], index: 8, kind: output, shape index: {}]   ;;  %s3423_s1 = inlined_call_operand.hbm [shape: s32[2,2], index: 1, kind: input, shape index: {}]   ;;  %s3424_s2 = inlined_call_operand.hbm [shape: s32[2,2], index: 2, kind: input, shape index: {}]   ;;  %s3425_s3 = inlined_call_operand.vmem [shape: s32[2,2], index: 3, kind: input, shape index: {}]   ;;  %s3426_s4 = inlined_call_operand.hbm [shape: s32[2,2], index: 4, kind: input, shape index: {}]  }
   0x1   :  { %3445 = sst [smem:[#allocation39_spill]] %s3419_s5  ;;  %s14_s29 = sshll.u32 %s3418_s0, 4  ;;  %s15_s29 = int_to_ptr.hbm [resolvable:$true] %s14_s29 }
   0x2   :  { %3446 = sst [smem:[#allocation40_spill]] %s3420_s6  ;;  %s19_s10 = sshll.u32 %s3423_s1, 4  ;;  %s20_s10 = int_to_ptr.hbm [resolvable:$true] %s19_s10 }
   0x3   :  { %3447 = sst [smem:[#allocation41_spill]] %s3421_s7  ;;  %s24_s15 = sshll.u32 %s3424_s2, 4  ;;  %s25_s15 = int_to_ptr.hbm [resolvable:$true] %s24_s15 }
   0x4   :  { %3448 = sst [smem:[#allocation42_spill]] %s3422_s8  ;;  %s29_s18 = sshll.u32 %s3425_s3, 4  ;;  %s30_s18 = int_to_ptr.vmem [resolvable:$true] %s29_s18 }
   0x5   :  { %17 = dma.hbm_to_smem %s15_s29, 16, %s1982_s11, [#allocation2] }
   0x6   :  { %22 = dma.hbm_to_smem %s20_s10, 32, %s1983_s12, [#allocation2] }
   0x7   :  { %s1984_s0 = smov [#allocation5]   ;;  %s1985_s19 = smov [#allocation6]  }
   0x8   :  { %27 = dma.hbm_to_smem %s25_s15, 32, %s1984_s0, [#allocation2] }
   0x9   :  { %32 = dma.vmem_to_smem %s30_s18, 32, %s1985_s19, [#allocation2] }
   0xa   :  { %s34_s21 = sshll.u32 %s3426_s4, 4  ;;  %s1986_s22 = smov [#allocation7]   ;;  %s35_s21 = int_to_ptr.hbm [resolvable:$true] %s34_s21 }
   0xb   :  { %37 = dma.hbm_to_smem %s35_s21, 32, %s1986_s22, [#allocation2] }
   0xc   :  { %1916 = dma.done.wait [#allocation2], 144 }
   0xd   :  { %1917 = vsyncadd [#allocation2], 4294967152 }
   0xe   :  { %40 = sfence }
   0xf   :  { %41 = vsyncpa [#allocation9], 0 }
  0x10   :  { %43 = vsyncpa [#allocation9 + $0x1], 0 }
  0x11   :  { %44 = vsyncpa [#allocation12], 0 }
  0x12   :  { %46 = vsyncpa [#allocation12 + $0x1], 0 }
  0x13   :  { %47 = vsyncpa [#allocation10], 0 }
  0x14   :  { %49 = vsyncpa [#allocation10 + $0x1], 0  ;;  %s2068_s2 = smov 0   ;;  %s2070_s3 = smov 0  }
  0x15   :  { %s2072_s23 = smov 0   ;;  %s2074_s24 = smov 0  }
  0x16   :  { %s2076_s4 = smov 0   ;;  %s2078_s25 = smov 0  }
  0x17   :  { %s2080_s26 = smov 0   ;;  %s2082_s27 = smov 0  }
  0x18   :  { %s2084_s28 = smov 0   ;;  %s2086_s29 = smov 0  }
  0x19   :  { %s2088_s30 = smov 0   ;;  %s2090_s9 = smov 0  }
  0x1a LB: > { %3449 = sst [smem:[#allocation30_spill]] %s1960_s26  ;;  %s2129_s10 = sadd.s32 4294967295, %s1980_s9   ;;  %s1980_s9 = sphi %s2090_s9, %s55_s9   ;;  %s1976_s30 = sphi %s2088_s30, %s3685_s30   ;;  %s1972_s29 = sphi %s2086_s29, %s3684_s29   ;;  %s1968_s28 = sphi %s2084_s28, %s3683_s28   ;;  %s1964_s27 = sphi %s2082_s27, %s3693_s27   ;;  %s1960_s26 = sphi %s2080_s26, %s3692_s26   ;;  %s1956_s25 = sphi %s2078_s25, %s3691_s25   ;;  %s1952_s4 = sphi %s2076_s4, %s3690_s4   ;;  %s1948_s24 = sphi %s2074_s24, %s3689_s24   ;;  %s1944_s23 = sphi %s2072_s23, %s3688_s23   ;;  %s1940_s3 = sphi %s2070_s3, %s3687_s3   ;;  %s1936_s2 = sphi %s2068_s2, %s3686_s2  }
  0x1b   : > { %3450 = sst [smem:[#allocation31_spill]] %s1968_s28  ;;  %s67_s11 = sadd.s32 1, %s1976_s30 }
  0x1c   : > { %3451 = sst [smem:[#allocation32_spill]] %s1972_s29  ;;  %s74_s12 = sadd.s32 1, %s1968_s28 }
  0x1d   : > { %3452 = sst [smem:[#allocation33_spill]] %s1976_s30  ;;  %p69_p0 = scmp.ge.s32.totalorder %s67_s11, 2 }
  0x1e   : > { %p81_p1 = scmp.ne.s32.totalorder %s1968_s28, %s1964_s27  ;;  %p82_p2 = scmp.eq.s32.totalorder %s1980_s9, 0 }
  0x1f   : > { %p3428_p3 = scmp.ne.s32.totalorder %s1964_s27, %s1960_s26  ;;  %s3695_s11 = smov (%p69_p0, %s67_s11), 0 }
  0x20   : > { %3453 = sst [smem:[#allocation34_spill]] %s3695_s11  ;;  %p2145_p4 = por %p82_p2, %p81_p1 }
  0x21   : > { %p88_p5 = scmp.eq.s32.totalorder %s2129_s10, 0  ;;  %s71_s14 = ssub.s32 %s1976_s30, %s3695_s11 }
  0x22   : > { %s97_s15 = sld [smem:[#allocation3 + %s1976_s30]]  ;;  %p72_p6 = scmp.eq.s32.totalorder %s71_s14, 0 }
  0x23   : > { %p2158_p7 = por %p88_p5, %p3428_p3  ;;  %s1450_s17 = sadd.s32 4294967294, %s1980_s9  }
  0x24   : > { %s98_s18 = sld [smem:[#allocation3 + %s3695_s11]]  ;;  %p111_p8 = scmp.ne.s32.totalorder %s1956_s25, %s1952_s4 }
  0x25   : > { %s3455_s16 = scalar_select %p2158_p7, 1, 0 }
  0x26   : > { %s2165_s0 = scalar_select %p72_p6, %s1968_s28, %s74_s12  }
  0x27   : > { %p117_p9 = scmp.ne.s32.totalorder %s1952_s4, %s1948_s24  ;;  %s104_s19 = sadd.s32 1, %s1956_s25 }
  0x28   : > { %3456 = sst [smem:[#allocation35_spill]] %s2165_s0  ;;  %p2175_p10 = por %p111_p8, %p82_p2 }
  0x29   : > { %s127_s1 = sld [smem:[#allocation3 + %s1976_s30]]  ;;  %p2181_p11 = por %p117_p9, %p88_p5 }
  0x2a   : > { %s129_s22 = sld [smem:[#allocation3 + %s3695_s11]]  ;;  %p143_p12 = scmp.ne.s32.totalorder %s1944_s23, %s1940_s3 }
  0x2b   : > { %s3458_s21 = scalar_select %p2181_p11, 1, 0 }
  0x2c   : > { %s100_s12 = ssub.s32 %s97_s15, %s98_s18  ;;  %p149_p13 = scmp.ne.s32.totalorder %s1940_s3, %s1936_s2 }
  0x2d   : > { %p102_p0 = scmp.eq.s32.totalorder %s100_s12, 0  ;;  %p2192_p6 = por %p143_p12, %p82_p2 }
  0x2e   : > { %p2198_p8 = por %p149_p13, %p88_p5  ;;  %p175_p9 = scmp.eq.s32.totalorder %s2129_s10, 1 }
  0x2f   : > { %s2204_s0 = scalar_select %p102_p0, %s1956_s25, %s104_s19  }
  0x30   : > { %s128_s11 = sadd.s32 1, %s127_s1  ;;  %p2209_p3 = por %p175_p9, %p81_p1 }
  0x31   : > { %3461 = sst [smem:[#allocation36_spill]] %s2204_s0  ;;  %s130_s2 = sadd.s32 1, %s129_s22 }
  0x32   : > { %p181_p11 = scmp.eq.s32.totalorder %s1450_s17, 1  ;;  %s132_s15 = ssub.s32 %s128_s11, %s130_s2 }
  0x33   : > { %s136_s18 = sadd.s32 1, %s1944_s23  ;;  %p134_p2 = scmp.eq.s32.totalorder %s132_s15, 0 }
  0x34   : > { %p3463_p12 = scmp.ne.s32.totalorder %s1964_s27, %s1960_s26  ;;  %p1452_p5 = scmp.ge.s32.totalorder %s1980_s9, 2 }
  0x35   : > { %s2222_s29 = scalar_select %p134_p2, %s1944_s23, %s136_s18  }
  0x36   : > { %p2217_p7 = por %p181_p11, %p3463_p12  ;;  %197 = sbr.rel (%p1452_p5) target bundleno = 112 (0x70), region = 16 }
  0x37   : > { %3466 = sst [smem:[#allocation38_spill]] %s2222_s29  ;;  %s201_s19 = sand.u32 (!%p1452_p5), 1, %s1968_s28  }
  0x38   : > { %s3464_s12 = scalar_select %p2217_p7, 1, 0 }
  0x39   : > { %s1601_s17 = sshll.u32 (!%p1452_p5), %s1976_s30, 7  ;;  %s1453_s11 = sshll.u32 (!%p1452_p5), %s201_s19, 7 }
  0x3a   : > { %3465 = sst [smem:[#allocation37_spill]] %s3464_s12  ;;  %s205_s0 = scalar_lea.vmem (!%p1452_p5), [#allocation8], %s1453_s11 }
  0x3b   : > { %s3467_s5 = sld [smem:[#allocation39_spill]]  ;;  %s213_s12 = sshll.u32 %s205_s0, 4  ;;  %s214_s12 = int_to_ptr.vmem [resolvable:$true] %s213_s12 }
  0x3c   : > { %s202_s18 = scalar_lea.sflag [#allocation9], %s201_s19  ;;  %s1987_s29 = smov 128  }
  0x3d   : > { %s1988_s26 = smov 8  }
  0x41   : > { %s210_s2 = scalar_lea.hbm %s3467_s5, %s1601_s17 }
  0x42   : > { %s211_s15 = sshll.u32 %s210_s2, 4  ;;  %s212_s15 = int_to_ptr.hbm [resolvable:$true] %s211_s15 }
  0x43   : > { %1621 = dma.hbm_to_vmem [thread:$0]  (%p2145_p4), %s212_s15, 2048, %s214_s12, %s202_s18, %s1987_s29, %s1987_s29, %s1988_s26  }
  0x44   : > { %s223_s1 = sand.u32 1, %s1980_s9   ;;  %s225_s17 = sand.u32 1, %s1956_s25  }
  0x45   : > { %s1456_s11 = sshll.u32 %s225_s17, 8  ;;  %s1989_s2 = smov 4096  }
  0x46   : > { %s1622_s0 = scalar_select %p2175_p10, [#allocation3], [#allocation21] }
  0x47   : > { %s1623_s19 = scalar_select %p2175_p10, %s1976_s30, 0 }
  0x48   : > { %s1624_s26 = scalar_select %p2175_p10, [#allocation0], [#allocation22] }
  0x49   : > { %s228_s29 = sld [smem:[%s1622_s0 + %s1623_s19]]  ;;  %s227_s13 = scalar_lea.vmem [#allocation11], %s1456_s11 }
  0x4a   : > { %s251_s12 = sshll.u32 %s227_s13, 4  ;;  %s241_s22 = sld [smem:[%s1624_s26]]   ;;  %s252_s12 = int_to_ptr.vmem [resolvable:$true] %s251_s12 }
  0x4b   : > { %1625 = sst [smem:[#allocation16]] (%p2175_p10), %s1989_s2  ;;  %s1990_s15 = smov 2048  }
  0x4c   : > { %1626 = sst [smem:[#allocation16 + $0x1]] (%p2175_p10), %s1990_s15  ;;  %s1991_s18 = smov 16  }
  0x4d   : > { %1627 = sst [smem:[#allocation16 + $0x2]] (%p2175_p10), %s1991_s18  ;;  %s1992_s17 = smov 128  }
  0x4e   : > { %1628 = sst [smem:[#allocation16 + $0x3]] (%p2175_p10), %s1992_s17  ;;  %s1993_s28 = smov 8  }
  0x4f   : > { %s1602_s5 = sshll.u32 %s228_s29, 7  ;;  %1629 = sst [smem:[#allocation16 + $0x4]] (%p2175_p10), %s1992_s17 }
  0x50   : > { %s3468_s6 = sld [smem:[#allocation40_spill]]  ;;  %s1459_s26 = sshll.u32 %s241_s22, 26 }
  0x51   : > { %s1460_s13 = sadd.s32 134217728, %s1459_s26  ;;  %1630 = sst [smem:[#allocation16 + $0x5]] (%p2175_p10), %s1993_s28 }
  0x52   : > { %s2258_s15 = scalar_lea.sflag [#allocation12], %s223_s1  ;;  %s1994_s18 = smov [#allocation15]  }
  0x56   : > { %s236_s19 = scalar_lea.hbm %s3468_s6, %s1602_s5 }
  0x57   : > { %s249_s2 = sshll.u32 %s236_s19, 4  ;;  %s250_s2 = int_to_ptr.hbm [resolvable:$true] %s249_s2 }
  0x58   : > { %1631 = dma.general (%p2175_p10), %s250_s2, 4096, %s252_s12, %s2258_s15, %s1994_s18, [#allocation16], %s1460_s13, 0  }
  0x59   : > { %s276_s5 = sand.u32 1, %s1944_s23   ;;  %s1995_s22 = smov 4096  }
  0x5a   : > { %s1461_s29 = sshll.u32 %s276_s5, 8  ;;  %1635 = sst [smem:[#allocation18]] (%p2192_p6), %s1995_s22 }
  0x5b   : > { %s1632_s28 = scalar_select %p2192_p6, [#allocation3], [#allocation23] }
  0x5c   : > { %s1633_s20 = scalar_select %p2192_p6, %s1976_s30, 0 }
  0x5d   : > { %s1634_s1 = scalar_select %p2192_p6, [#allocation0], [#allocation24] }
  0x5e   : > { %s279_s12 = sld [smem:[%s1632_s28 + %s1633_s20]]  ;;  %s278_s17 = scalar_lea.vmem [#allocation13], %s1461_s29 }
  0x5f   : > { %s303_s11 = sshll.u32 %s278_s17, 4  ;;  %s293_s0 = sld [smem:[%s1634_s1]]   ;;  %s304_s11 = int_to_ptr.vmem [resolvable:$true] %s303_s11 }
  0x60   : > { %s1996_s19 = smov 2048   ;;  %s1997_s26 = smov 16  }
  0x61   : > { %1636 = sst [smem:[#allocation18 + $0x1]] (%p2192_p6), %s1996_s19  ;;  %s1998_s13 = smov 128  }
  0x62   : > { %1637 = sst [smem:[#allocation18 + $0x2]] (%p2192_p6), %s1997_s26  ;;  %s1999_s18 = smov 8  }
  0x63   : > { %1638 = sst [smem:[#allocation18 + $0x3]] (%p2192_p6), %s1998_s13  ;;  %s2000_s19 = smov [#allocation17]  }
  0x64   : > { %1639 = sst [smem:[#allocation18 + $0x4]] (%p2192_p6), %s1998_s13  ;;  %s1603_s2 = sshll.u32 %s279_s12, 7 }
  0x65   : > { %1640 = sst [smem:[#allocation18 + $0x5]] (%p2192_p6), %s1999_s18  ;;  %s1464_s28 = sshll.u32 %s293_s0, 26 }
  0x66   : > { %s3469_s7 = sld [smem:[#allocation41_spill]]  ;;  %s1465_s1 = sadd.s32 134217728, %s1464_s28 }
  0x6c   : > { %s1365_s22 = scalar_lea.hbm %s3469_s7, %s1603_s2 }
  0x6d   : > { %s1366_s20 = scalar_lea.hbm %s1365_s22, 128 }
  0x6e   : > { %s301_s17 = sshll.u32 %s1366_s20, 4  ;;  %s302_s17 = int_to_ptr.hbm [resolvable:$true] %s301_s17 }
  0x6f   : > { %1641 = dma.general (%p2192_p6), %s302_s17, 4096, %s304_s11, %s2258_s15, %s2000_s19, [#allocation18], %s1465_s1, 0  }
  0x70 PF: > { %p1466_p1 = scmp.ge.s32.totalorder %s1980_s9, 1  ;;  %p324_p4 = scmp.lt.s32.totalorder %s1980_s9, 3 }
  0x72   : > { %p325_p10 = pnand %p1466_p1, %p324_p4 }
  0x73   : > { %s2292_s12 = sand.u32 (!%p325_p10), 1, %s1964_s27   ;;  %p3470_p11 = scmp.ne.s32.totalorder (!%p325_p10), %s3455_s16, 0 }
  0x74   : > { %328 = sbr.rel (%p325_p10) target bundleno = 434 (0x1b2), region = 32  ;;  %s1467_s0 = sshll.u32 (!%p325_p10), %s2292_s12, 7 }
  0x75   : > { %s331_s26 = scalar_lea.sflag (!%p325_p10), [#allocation9], %s2292_s12  ;;  %s2296_s13 = scalar_lea.vmem (!%p325_p10), [#allocation8], %s1467_s0 }
  0x79   : > { %1919 = dma.done.wait (%p3470_p11), %s331_s26, 2048  }
  0x7a   : > { %1921 = vsyncadd (%p3470_p11), %s331_s26, 4294965248  ;;  %s340_s24 = sand.u32 1, %s2129_s10   ;;  %s342_s15 = sand.u32 1, %s1952_s4  }
  0x7b   : > { %s1468_s11 = sshll.u32 %s342_s15, 8  ;;  %s341_s2 = scalar_lea.sflag [#allocation12], %s340_s24 }
  0x7c   : > { %s2304_s18 = scalar_lea.vmem [#allocation11], %s1468_s11  ;;  %p3471_p13 = scmp.ne.s32.totalorder %s3458_s21, 0 }
  0x7e   : > { %1923 = dma.done.wait (%p3471_p13), %s341_s2, 4096  }
  0x7f   : > { %1925 = vsyncadd (%p3471_p13), %s341_s2, 4294963200  ;;  %s352_s5 = sand.u32 1, %s1940_s3  }
  0x80   : > { %s1469_s29 = sshll.u32 %s352_s5, 8 }
  0x81   : > { %s2311_s16 = scalar_lea.vmem [#allocation13], %s1469_s29 }
  0x82   : > { %1927 = dma.done.wait (%p2198_p8), %s341_s2, 4096  }
  0x83   : > { %1929 = vsyncadd (%p2198_p8), %s341_s2, 4294963200  ;;  %v489_v0 = vld [vmem:[%s2311_s16 + $0x70] sm:$0xff]  ;;  %v490_v1 = vld [vmem:[%s2311_s16 + $0x78] sm:$0xff]  ;;  %s2405_s10 = sld [smem:[#allocation4]] }
  0x84   : > { %v465_v2 = vld [vmem:[%s2304_s18 + $0x70] sm:$0xff]  ;;  %v498_v3 = vpack.c.bf16 %v490_v1, %v489_v0  ;;  %v466_v4 = vld [vmem:[%s2304_s18 + $0x78] sm:$0xff]  ;;  %v487_v11 = vld [vmem:[%s2311_s16 + $0x60] sm:$0xff]  ;;  %s2409_s21 = sld [smem:[#allocation5]] }
  0x85   : > { %v1570_v5 = vld [vmem:[%s2311_s16 + $0xf0] sm:$0xff]  ;;  %v1571_v6 = vld [vmem:[%s2311_s16 + $0xf8] sm:$0xff]  ;;  %v474_v7 = vpack.c.bf16 %v466_v4, %v465_v2  ;;  %v488_v13 = vld [vmem:[%s2311_s16 + $0x68] sm:$0xff]  ;;  %s2413_s14 = sld [smem:[#allocation4 + $0x1]] }
  0x86   : > { %v950_v8 = vpack.c.bf16 %v1571_v6, %v1570_v5  ;;  %v1554_v9 = vld [vmem:[%s2304_s18 + $0xf0] sm:$0xff]  ;;  %v1555_v10 = vld [vmem:[%s2304_s18 + $0xf8] sm:$0xff]  ;;  %547 = vmatpush.bf16.msra.mxu0 %v498_v3  ;;  %v463_v14 = vld [vmem:[%s2304_s18 + $0x60] sm:$0xff]  ;;  %v497_v16 = vpack.c.bf16 %v488_v13, %v487_v11  ;;  %s2415_s22 = sld [smem:[#allocation5 + $0x1]] }
  0x87   : > { %v925_v12 = vpack.c.bf16 %v1555_v10, %v1554_v9  ;;  %v464_v15 = vld [vmem:[%s2304_s18 + $0x68] sm:$0xff]  ;;  %628 = vmatpush.bf16.msra.mxu1 %v474_v7  ;;  %v1568_v18 = vld [vmem:[%s2311_s16 + $0xe0] sm:$0xff]  ;;  %v485_v23 = vld [vmem:[%s2311_s16 + $0x50] sm:$0xff]  ;;  %s3472_s28 = sld [smem:[#allocation32_spill]] }
  0x88   : > { %951 = vmatpush.bf16.msra.mxu2 %v950_v8  ;;  %v473_v17 = vpack.c.bf16 %v464_v15, %v463_v14  ;;  %v1569_v19 = vld [vmem:[%s2311_s16 + $0xe8] sm:$0xff]  ;;  %v1552_v20 = vld [vmem:[%s2304_s18 + $0xe0] sm:$0xff]  ;;  %v486_v24 = vld [vmem:[%s2311_s16 + $0x58] sm:$0xff]  ;;  %s2417_s20 = sld [smem:[#allocation6]] }
  0x89   : > { %1000 = vmatpush.bf16.msra.mxu3 %v925_v12  ;;  %v949_v21 = vpack.c.bf16 %v1569_v19, %v1568_v18  ;;  %v1553_v22 = vld [vmem:[%s2304_s18 + $0xe8] sm:$0xff]  ;;  %v461_v26 = vld [vmem:[%s2304_s18 + $0x50] sm:$0xff]  ;;  %v462_v27 = vld [vmem:[%s2304_s18 + $0x58] sm:$0xff]  ;;  %v496_v29 = vpack.c.bf16 %v486_v24, %v485_v23  ;;  %s2419_s1 = sld [smem:[#allocation7]] }
  0x8a   : > { %v924_v25 = vpack.c.bf16 %v1553_v22, %v1552_v20  ;;  %v1566_v28 = vld [vmem:[%s2311_s16 + $0xd0] sm:$0xff]  ;;  %548 = vmatpush.bf16.msra.mxu0 %v497_v16  ;;  %v1567_v30 = vld [vmem:[%s2311_s16 + $0xd8] sm:$0xff]  ;;  %v472_v33 = vpack.c.bf16 %v462_v27, %v461_v26  ;;  %v483_v35 = vld [vmem:[%s2311_s16 + $0x40] sm:$0xff]  ;;  %s2421_s17 = sld [smem:[#allocation6 + $0x1]]  ;;  %s682_s5 = sadd.s32 %s2409_s21, %s2405_s10 }
  0x8b   : > { %v1550_v31 = vld [vmem:[%s2304_s18 + $0xd0] sm:$0xff]  ;;  %v1551_v32 = vld [vmem:[%s2304_s18 + $0xd8] sm:$0xff]  ;;  %629 = vmatpush.bf16.msra.mxu1 %v473_v17  ;;  %v948_v34 = vpack.c.bf16 %v1567_v30, %v1566_v28  ;;  %v484_v36 = vld [vmem:[%s2311_s16 + $0x48] sm:$0xff]  ;;  %s2423_s19 = sld [smem:[#allocation7 + $0x1]] }
  0x8c   : > { %952 = vmatpush.bf16.msra.mxu2 %v949_v21  ;;  %v459_v37 = vld [vmem:[%s2304_s18 + $0x40] sm:$0xff]  ;;  %v923_v38 = vpack.c.bf16 %v1551_v32, %v1550_v31  ;;  %v460_v39 = vld [vmem:[%s2304_s18 + $0x48] sm:$0xff]  ;;  %v495_v44 = vpack.c.bf16 %v484_v36, %v483_v35  ;;  %v481_v47 = vld [vmem:[%s2311_s16 + $0x30] sm:$0xff]  ;;  %s2425_s0 = sld [smem:[#allocation4 + $0x80]] }
  0x8d   : > { %1001 = vmatpush.bf16.msra.mxu3 %v924_v25  ;;  %v1564_v40 = vld [vmem:[%s2311_s16 + $0xc0] sm:$0xff]  ;;  %v1565_v41 = vld [vmem:[%s2311_s16 + $0xc8] sm:$0xff]  ;;  %v471_v45 = vpack.c.bf16 %v460_v39, %v459_v37  ;;  %v482_v48 = vld [vmem:[%s2311_s16 + $0x38] sm:$0xff]  ;;  %s2427_s26 = sld [smem:[#allocation5 + $0x80]]  ;;  %s1471_s11 = sshll.u32 %s3472_s28, 7 }
  0x8e   : > { %v1548_v42 = vld [vmem:[%s2304_s18 + $0xc0] sm:$0xff]  ;;  %v1549_v43 = vld [vmem:[%s2304_s18 + $0xc8] sm:$0xff]  ;;  %549 = vmatpush.bf16.msra.mxu0 %v496_v29  ;;  %v947_v46 = vpack.c.bf16 %v1565_v41, %v1564_v40  ;;  %v457_v49 = vld [vmem:[%s2304_s18 + $0x30] sm:$0xff]  ;;  %v494_v56 = vpack.c.bf16 %v482_v48, %v481_v47  ;;  %s2429_s24 = sld [smem:[#allocation4 + $0x81]] }
  0x8f   : > { %630 = vmatpush.bf16.msra.mxu1 %v472_v33  ;;  %v922_v50 = vpack.c.bf16 %v1549_v43, %v1548_v42  ;;  %v458_v51 = vld [vmem:[%s2304_s18 + $0x38] sm:$0xff]  ;;  %v1562_v52 = vld [vmem:[%s2311_s16 + $0xb0] sm:$0xff]  ;;  %v479_v59 = vld [vmem:[%s2311_s16 + $0x20] sm:$0xff]  ;;  %s2431_s15 = sld [smem:[#allocation5 + $0x81]]  ;;  %s715_s7 = sadd.s32 %s2419_s1, %s2417_s20 }
  0x90   : > { %953 = vmatpush.bf16.msra.mxu2 %v948_v34  ;;  %v1563_v53 = vld [vmem:[%s2311_s16 + $0xb8] sm:$0xff]  ;;  %v1546_v54 = vld [vmem:[%s2304_s18 + $0xb0] sm:$0xff]  ;;  %v470_v57 = vpack.c.bf16 %v458_v51, %v457_v49  ;;  %v480_v60 = vld [vmem:[%s2311_s16 + $0x28] sm:$0xff]  ;;  %s2434_s2 = sld [smem:[#allocation6 + $0x80]] }
  0x91   : > { %1002 = vmatpush.bf16.msra.mxu3 %v923_v38  ;;  %v1547_v55 = vld [vmem:[%s2304_s18 + $0xb8] sm:$0xff]  ;;  %v946_v58 = vpack.c.bf16 %v1563_v53, %v1562_v52  ;;  %v455_v61 = vld [vmem:[%s2304_s18 + $0x20] sm:$0xff]  ;;  %v456_v63 = vld [vmem:[%s2304_s18 + $0x28] sm:$0xff]  ;;  %v493_v4 = vpack.c.bf16 %v480_v60, %v479_v59  ;;  %s2442_s29 = sld [smem:[#allocation6 + $0x81]]  ;;  %s768_s30 = sadd.s32 %s2423_s19, %s2421_s17 }
  0x92   : > { %550 = vmatpush.bf16.msra.mxu0 %v495_v44  ;;  %v921_v62 = vpack.c.bf16 %v1547_v55, %v1546_v54  ;;  %v1560_v0 = vld [vmem:[%s2311_s16 + $0xa0] sm:$0xff]  ;;  %v1561_v1 = vld [vmem:[%s2311_s16 + $0xa8] sm:$0xff]  ;;  %v469_v5 = vpack.c.bf16 %v456_v63, %v455_v61  ;;  %v477_v7 = vld [vmem:[%s2311_s16 + $0x10] sm:$0xff]  ;;  %s2450_s6 = sld [smem:[#allocation7 + $0x81]] }
  0x93   : > { %631 = vmatpush.bf16.msra.mxu1 %v471_v45  ;;  %v1544_v2 = vld [vmem:[%s2304_s18 + $0xa0] sm:$0xff]  ;;  %v1545_v3 = vld [vmem:[%s2304_s18 + $0xa8] sm:$0xff]  ;;  %v945_v6 = vpack.c.bf16 %v1561_v1, %v1560_v0  ;;  %v478_v8 = vld [vmem:[%s2311_s16 + $0x18] sm:$0xff] }
  0x94   : > { %954 = vmatpush.bf16.msra.mxu2 %v947_v46  ;;  %v453_v9 = vld [vmem:[%s2304_s18 + $0x10] sm:$0xff]  ;;  %v920_v10 = vpack.c.bf16 %v1545_v3, %v1544_v2  ;;  %v454_v11 = vld [vmem:[%s2304_s18 + $0x18] sm:$0xff]  ;;  %v492_v16 = vpack.c.bf16 %v478_v8, %v477_v7  ;;  %v475_v19 = vld [vmem:[%s2311_s16] sm:$0xff] }
  0x95   : > { %1003 = vmatpush.bf16.msra.mxu3 %v922_v50  ;;  %v1558_v12 = vld [vmem:[%s2311_s16 + $0x90] sm:$0xff]  ;;  %v1559_v13 = vld [vmem:[%s2311_s16 + $0x98] sm:$0xff]  ;;  %v468_v17 = vpack.c.bf16 %v454_v11, %v453_v9  ;;  %v476_v20 = vld [vmem:[%s2311_s16 + $0x8] sm:$0xff] }
  0x96   : > { %551 = vmatpush.bf16.msra.mxu0 %v494_v56  ;;  %v1542_v14 = vld [vmem:[%s2304_s18 + $0x90] sm:$0xff]  ;;  %v1543_v15 = vld [vmem:[%s2304_s18 + $0x98] sm:$0xff]  ;;  %v944_v18 = vpack.c.bf16 %v1559_v13, %v1558_v12  ;;  %v451_v21 = vld [vmem:[%s2304_s18] sm:$0xff]  ;;  %v491_v28 = vpack.c.bf16 %v476_v20, %v475_v19  ;;  %v2446_v12 = vstv %s1471_s11 }
  0x97   : > { %632 = vmatpush.bf16.msra.mxu1 %v470_v57  ;;  %v919_v22 = vpack.c.bf16 %v1543_v15, %v1542_v14  ;;  %v452_v23 = vld [vmem:[%s2304_s18 + $0x8] sm:$0xff]  ;;  %v1556_v24 = vld [vmem:[%s2311_s16 + $0x80] sm:$0xff]  ;;  %v1606_v38 = vld [vmem:[%s2296_s13 + $0x14] sm:$0xf] }
  0x98   : > { %955 = vmatpush.bf16.msra.mxu2 %v946_v58  ;;  %v1557_v25 = vld [vmem:[%s2311_s16 + $0x88] sm:$0xff]  ;;  %v1540_v26 = vld [vmem:[%s2304_s18 + $0x80] sm:$0xff]  ;;  %v467_v31 = vpack.c.bf16 %v452_v23, %v451_v21  ;;  %v1476_v39 = vld [vmem:[%s2296_s13 + $0x18] sm:$0xf0]  ;;  %s691_s16 = sadd.s32 %s2415_s22, %s2413_s14  ;;  %v689_v21 = vstv %s2413_s14  ;;  %s1274_s14 = scalar_lea.sflag [#allocation10], %s2292_s12 }
  0x99   : > { %1004 = vmatpush.bf16.msra.mxu3 %v921_v62  ;;  %v1541_v27 = vld [vmem:[%s2304_s18 + $0x88] sm:$0xff]  ;;  %v1604_v29 = vld [vmem:[%s2296_s13 + $0x4] sm:$0xf]  ;;  %v943_v32 = vpack.c.bf16 %v1557_v25, %v1556_v24  ;;  %v1506_v33 = vld [vmem:[%s2296_s13] sm:$0xf]  ;;  %v1479_v42 = vor.u32 %v1606_v38, %v1476_v39  ;;  %s2436_s18 = sld [smem:[#allocation7 + $0x80]]  ;;  %v2465_v24 = vstv %s2417_s20 }
  0x9a   : > { %552 = vmatpush.bf16.msra.mxu0 %v493_v4  ;;  %v1472_v30 = vld [vmem:[%s2296_s13 + $0x8] sm:$0xf0]  ;;  %v1605_v34 = vld [vmem:[%s2296_s13 + $0x4] sm:$0xf0]  ;;  %v918_v35 = vpack.c.bf16 %v1541_v27, %v1540_v26  ;;  %v1510_v40 = vld [vmem:[%s2296_s13 + $0x10] sm:$0xf]  ;;  %v2467_v25 = vstv %s715_s7  ;;  %s1063_s7 = sadd.s32 %s2431_s15, %s2429_s24 }
  0x9b   : > { %633 = vmatpush.bf16.msra.mxu1 %v469_v5  ;;  %v1475_v36 = vor.u32 %v1604_v29, %v1472_v30  ;;  %v1507_v37 = vor.u32 %v1605_v34, %v1506_v33  ;;  %v1607_v41 = vld [vmem:[%s2296_s13 + $0x14] sm:$0xf0]  ;;  %v1608_v44 = vld [vmem:[%s2296_s13 + $0x24] sm:$0xf]  ;;  %v1480_v45 = vld [vmem:[%s2296_s13 + $0x28] sm:$0xf0]  ;;  %v2470_v26 = vstv %s2421_s17 }
  0x9c   : > { %956 = vmatpush.bf16.msra.mxu2 %v945_v6  ;;  %v1511_v43 = vor.u32 %v1607_v41, %v1510_v40  ;;  %v1514_v46 = vld [vmem:[%s2296_s13 + $0x20] sm:$0xf]  ;;  %v1609_v47 = vld [vmem:[%s2296_s13 + $0x24] sm:$0xf0]  ;;  %v1483_v48 = vor.u32 %v1608_v44, %v1480_v45  ;;  %v1610_v50 = vld [vmem:[%s2296_s13 + $0x34] sm:$0xf]  ;;  %v2472_v27 = vstv %s768_s30 }
  0x9d   : > { %1005 = vmatpush.bf16.msra.mxu3 %v920_v10  ;;  %v1515_v49 = vor.u32 %v1609_v47, %v1514_v46  ;;  %v1484_v51 = vld [vmem:[%s2296_s13 + $0x38] sm:$0xf0]  ;;  %v1518_v52 = vld [vmem:[%s2296_s13 + $0x30] sm:$0xf]  ;;  %v1611_v53 = vld [vmem:[%s2296_s13 + $0x34] sm:$0xf0]  ;;  %v413_v10 = vlaneseq  ;;  %v1061_v34 = vstv %s2429_s24 }
  0x9e   : > { %553 = vmatpush.bf16.msra.mxu0 %v492_v16  ;;  %v1487_v54 = vor.u32 %v1610_v50, %v1484_v51  ;;  %v1519_v55 = vor.u32 %v1611_v53, %v1518_v52  ;;  %v1612_v56 = vld [vmem:[%s2296_s13 + $0x44] sm:$0xf]  ;;  %v1488_v57 = vld [vmem:[%s2296_s13 + $0x48] sm:$0xf0]  ;;  %v1522_v58 = vld [vmem:[%s2296_s13 + $0x40] sm:$0xf]  ;;  %v680_v16 = vstv %s2405_s10  ;;  %s1140_s10 = sadd.s32 %s2450_s6, %s2442_s29 }
  0x9f   : > { %634 = vmatpush.bf16.msra.mxu1 %v468_v17  ;;  %v1613_v59 = vld [vmem:[%s2296_s13 + $0x44] sm:$0xf0]  ;;  %v1491_v60 = vor.u32 %v1612_v56, %v1488_v57  ;;  %v1614_v62 = vld [vmem:[%s2296_s13 + $0x54] sm:$0xf]  ;;  %v1492_v63 = vld [vmem:[%s2296_s13 + $0x58] sm:$0xf0]  ;;  %v683_v17 = vstv %s682_s5  ;;  %s1087_s30 = sadd.s32 %s2436_s18, %s2434_s2 }
  0xa0   : > { %957 = vmatpush.bf16.msra.mxu2 %v944_v18  ;;  %v1523_v61 = vor.u32 %v1613_v59, %v1522_v58  ;;  %v1526_v0 = vld [vmem:[%s2296_s13 + $0x50] sm:$0xf]  ;;  %v1615_v1 = vld [vmem:[%s2296_s13 + $0x54] sm:$0xf0]  ;;  %v1495_v2 = vor.u32 %v1614_v62, %v1492_v63  ;;  %v1616_v4 = vld [vmem:[%s2296_s13 + $0x64] sm:$0xf]  ;;  %v2507_v38 = vstv %s1087_s30 }
  0xa1   : > { %1006 = vmatpush.bf16.msra.mxu3 %v919_v22  ;;  %v1527_v3 = vor.u32 %v1615_v1, %v1526_v0  ;;  %v1496_v5 = vld [vmem:[%s2296_s13 + $0x68] sm:$0xf0]  ;;  %v1530_v6 = vld [vmem:[%s2296_s13 + $0x60] sm:$0xf]  ;;  %v1617_v7 = vld [vmem:[%s2296_s13 + $0x64] sm:$0xf0]  ;;  %v692_v22 = vstv %s691_s16 }
  0xa2   : > { %554 = vmatpush.bf16.msra.mxu0 %v491_v28  ;;  %v1499_v8 = vor.u32 %v1616_v4, %v1496_v5  ;;  %v1531_v9 = vor.u32 %v1617_v7, %v1530_v6  ;;  %v2438_v11 = vshrl.u32 %v413_v10, 7  ;;  %v1618_v13 = vld [vmem:[%s2296_s13 + $0x74] sm:$0xf]  ;;  %v1500_v14 = vld [vmem:[%s2296_s13 + $0x78] sm:$0xf0]  ;;  %v414_v15 = vand.u32 127, %v413_v10 }
  0xa3   : > { %635 = vmatpush.bf16.msra.mxu1 %v467_v31  ;;  %v1534_v18 = vld [vmem:[%s2296_s13 + $0x70] sm:$0xf]  ;;  %v1619_v19 = vld [vmem:[%s2296_s13 + $0x74] sm:$0xf0]  ;;  %v1503_v23 = vor.u32 %v1618_v13, %v1500_v14  ;;  %s1054_s13 = sadd.s32 %s2427_s26, %s2425_s0  ;;  %v1052_v31 = vstv %s2425_s0  ;;  %v2511_v40 = vstv %s2442_s29  ;;  %s1470_s6 = sshll.u32 %s2292_s12, 8 }
  0xa4   : > { %958 = vmatpush.bf16.msra.mxu2 %v943_v32  ;;  %v434_v20 = vadd.s32 %v2446_v12, %v2438_v11  ;;  %vm681_vm0 = vcmp.le.s32.totalorder %v680_v16, %v414_v15  ;;  %vm684_vm1 = vcmp.lt.s32.totalorder %v414_v15, %v683_v17  ;;  %v1535_v28 = vor.u32 %v1619_v19, %v1534_v18  ;;  %s2597_s21 = scalar_lea.vmem [#allocation14], %s1470_s6 }
  0xa5   : > { %1007 = vmatpush.bf16.msra.mxu3 %v918_v35  ;;  %555 = vmatmul.bf16.vlgmr.msra.gmra.mxu0 %v1475_v36  ;;  %vm690_vm2 = vcmp.le.s32.totalorder %v689_v21, %v414_v15  ;;  %vm693_vm3 = vcmp.lt.s32.totalorder %v414_v15, %v692_v22  ;;  %vm2480_vm6 = vmand %vm681_vm0, %vm684_vm1  ;;  %v1055_v32 = vstv %s1054_s13  ;;  %v1064_v35 = vstv %s1063_s7 }
  0xa6   : > { %636 = vmatmul.bf16.vlgmr.msra.gmra.mxu1 %v1507_v37  ;;  %vm699_vm4 = vcmp.le.s32.totalorder %v2465_v24, %v434_v20  ;;  %vm717_vm5 = vcmp.lt.s32.totalorder %v434_v20, %v2467_v25  ;;  %vm752_vm7 = vcmp.le.s32.totalorder %v2470_v26, %v434_v20  ;;  %vm770_vm8 = vcmp.lt.s32.totalorder %v434_v20, %v2472_v27  ;;  %vm2488_vm9 = vmand %vm690_vm2, %vm693_vm3 }
  0xa7   : > { %959 = vmatmul.bf16.vlgmr.msra.gmra.mxu2 %v1475_v36  ;;  %vm2495_vm10 = vmand %vm699_vm4, %vm717_vm5  ;;  %v418_v39 = vadd.s32 8, %v2438_v11  ;;  %vm1053_vm12 = vcmp.le.s32.totalorder %v1052_v31, %v414_v15  ;;  %vm1056_vm13 = vcmp.lt.s32.totalorder %v414_v15, %v1055_v32  ;;  %v2513_v41 = vstv %s1140_s10 }
  0xa8   : > { %1008 = vmatmul.bf16.vlgmr.msra.gmra.mxu3 %v1507_v37  ;;  %vm2500_vm11 = vmand %vm752_vm7, %vm770_vm8  ;;  %v2505_v37 = vstv %s2434_s2  ;;  %vm1062_vm15 = vcmp.le.s32.totalorder %v1061_v34, %v414_v15  ;;  %vm1065_vm0 = vcmp.lt.s32.totalorder %v414_v15, %v1064_v35  ;;  %vm1089_vm3 = vcmp.lt.s32.totalorder %v434_v20, %v2507_v38 }
  0xa9   : > { %vm2519_vm14 = vmor %vm2480_vm6, %vm2488_vm9  ;;  %vm1071_vm2 = vcmp.le.s32.totalorder %v2505_v37, %v434_v20  ;;  %vm1124_vm5 = vcmp.le.s32.totalorder %v2511_v40, %v434_v20  ;;  %vm1142_vm6 = vcmp.lt.s32.totalorder %v434_v20, %v2513_v41  ;;  %v419_v46 = vadd.s32 16, %v2438_v11 }
  0xaa   : > { %vm802_vm1 = vmor %vm2495_vm10, %vm2500_vm11  ;;  %v420_v57 = vadd.s32 24, %v2438_v11  ;;  %v421_v13 = vadd.s32 32, %v2438_v11  ;;  %v422_v32 = vadd.s32 40, %v2438_v11  ;;  %v423_v53 = vadd.s32 48, %v2438_v11 }
  0xab   : > { %vm1057_vm4 = vmand %vm1053_vm12, %vm1056_vm13  ;;  %v436_v51 = vadd.s32 %v2446_v12, %v419_v46 }
  0xac   : > { %vm1066_vm7 = vmand %vm1062_vm15, %vm1065_vm0  ;;  %v437_v62 = vadd.s32 %v2446_v12, %v420_v57  ;;  %v438_v22 = vadd.s32 %v2446_v12, %v421_v13  ;;  %v439_v44 = vadd.s32 %v2446_v12, %v422_v32 }
  0xad   : > { %vm2532_vm8 = vmand %vm1071_vm2, %vm1089_vm3 }
  0xae   : > { %vm2536_vm9 = vmand %vm1124_vm5, %vm1142_vm6 }
  0xaf   : > { %vm2543_vm10 = vmor %vm2519_vm14, %vm802_vm1 }
  0xb0   : > { %vm2549_vm13 = vmor %vm1057_vm4, %vm1066_vm7 }
  0xb5   : > { %560 = vmatmul.bf16.gmra.mxu0 %v1479_v42 }
  0xb6   : > { %641 = vmatmul.bf16.gmra.mxu1 %v1511_v43 }
  0xb7   : > { %964 = vmatmul.bf16.gmra.mxu2 %v1479_v42  ;;  %v3481_v42 = vmov 0 }
  0xb8   : > { %1013 = vmatmul.bf16.gmra.mxu3 %v1511_v43  ;;  %v3482_v42 = vsel %vm2519_vm14, 4294967295, %v3481_v42  ;;  %v435_v43 = vadd.s32 %v2446_v12, %v418_v39 }
  0xba   : > { %vm700_vm11 = vcmp.le.s32.totalorder %v2465_v24, %v435_v43  ;;  %vm718_vm12 = vcmp.lt.s32.totalorder %v435_v43, %v2467_v25  ;;  %vm753_vm15 = vcmp.le.s32.totalorder %v2470_v26, %v435_v43  ;;  %vm771_vm0 = vcmp.lt.s32.totalorder %v435_v43, %v2472_v27 }
  0xbb   : > { %vm1072_vm2 = vcmp.le.s32.totalorder %v2505_v37, %v435_v43  ;;  %vm1090_vm3 = vcmp.lt.s32.totalorder %v435_v43, %v2507_v38  ;;  %vm2562_vm5 = vmand %vm700_vm11, %vm718_vm12  ;;  %vm1125_vm4 = vcmp.le.s32.totalorder %v2511_v40, %v435_v43  ;;  %vm1143_vm6 = vcmp.lt.s32.totalorder %v435_v43, %v2513_v41 }
  0xbc   : > { %vm2569_vm7 = vmand %vm753_vm15, %vm771_vm0  ;;  %vm701_vm0 = vcmp.le.s32.totalorder %v2465_v24, %v436_v51 }
  0xbd   : > { %vm2573_vm1 = vmand %vm1072_vm2, %vm1090_vm3  ;;  %vm719_vm2 = vcmp.lt.s32.totalorder %v436_v51, %v2467_v25 }
  0xbe   : > { %vm2577_vm11 = vmand %vm1125_vm4, %vm1143_vm6 }
  0xbf   : > { %vm3499_vm12 = vmor %vm2532_vm8, %vm2536_vm9  ;;  %vm754_vm8 = vcmp.le.s32.totalorder %v2470_v26, %v436_v51  ;;  %vm772_vm9 = vcmp.lt.s32.totalorder %v436_v51, %v2472_v27 }
  0xc0   : > { %vm2591_vm15 = vmor %vm2549_vm13, %vm3499_vm12  ;;  %vm1126_vm12 = vcmp.le.s32.totalorder %v2511_v40, %v436_v51 }
  0xc1   : > { %vm1175_vm3 = vmor %vm2573_vm1, %vm2577_vm11  ;;  %vm1073_vm1 = vcmp.le.s32.totalorder %v2505_v37, %v436_v51 }
  0xc2   : > { %vm2610_vm4 = vmand %vm701_vm0, %vm719_vm2  ;;  %vm1144_vm0 = vcmp.lt.s32.totalorder %v436_v51, %v2513_v41 }
  0xc3   : > { %vm2629_vm11 = vmor %vm2549_vm13, %vm1175_vm3  ;;  %vm755_vm3 = vcmp.le.s32.totalorder %v2470_v26, %v437_v62 }
  0xc5   : > { %565 = vmatmul.bf16.gmra.mxu0 %v1483_v48 }
  0xc6   : > { %646 = vmatmul.bf16.gmra.mxu1 %v1515_v49 }
  0xc7   : > { %969 = vmatmul.bf16.gmra.mxu2 %v1483_v48  ;;  %v3489_v48 = vmov 0 }
  0xc8   : > { %1018 = vmatmul.bf16.gmra.mxu3 %v1515_v49  ;;  %v3490_v48 = vsel %vm2549_vm13, 4294967295, %v3489_v48  ;;  %vm2653_vm13 = vmand %vm1126_vm12, %vm1144_vm0  ;;  %vm1074_vm12 = vcmp.le.s32.totalorder %v2505_v37, %v437_v62  ;;  %vm1092_vm0 = vcmp.lt.s32.totalorder %v437_v62, %v2507_v38 }
  0xd5   : > { %570 = vmatmul.bf16.gmra.mxu0 %v1487_v54 }
  0xd6   : > { %651 = vmatmul.bf16.gmra.mxu1 %v1519_v55 }
  0xd7   : > { %974 = vmatmul.bf16.gmra.mxu2 %v1487_v54 }
  0xd8   : > { %1023 = vmatmul.bf16.gmra.mxu3 %v1519_v55 }
  0xe5   : > { %575 = vmatmul.bf16.gmra.mxu0 %v1491_v60 }
  0xe6   : > { %656 = vmatmul.bf16.gmra.mxu1 %v1523_v61 }
  0xe7   : > { %979 = vmatmul.bf16.gmra.mxu2 %v1491_v60 }
  0xe8   : > { %1028 = vmatmul.bf16.gmra.mxu3 %v1523_v61 }
  0xf5   : > { %580 = vmatmul.bf16.gmra.mxu0 %v1495_v2 }
  0xf6   : > { %661 = vmatmul.bf16.gmra.mxu1 %v1527_v3 }
  0xf7   : > { %984 = vmatmul.bf16.gmra.mxu2 %v1495_v2 }
  0xf8   : > { %1033 = vmatmul.bf16.gmra.mxu3 %v1527_v3 }
 0x105   : > { %585 = vmatmul.bf16.gmra.mxu0 %v1499_v8 }
 0x106   : > { %666 = vmatmul.bf16.gmra.mxu1 %v1531_v9 }
 0x107   : > { %989 = vmatmul.bf16.gmra.mxu2 %v1499_v8 }
 0x108   : > { %1038 = vmatmul.bf16.gmra.mxu3 %v1531_v9 }
 0x115   : > { %590 = vmatmul.bf16.gmra.mxu0 %v1503_v23 }
 0x116   : > { %671 = vmatmul.bf16.gmra.mxu1 %v1535_v28 }
 0x117   : > { %994 = vmatmul.bf16.gmra.mxu2 %v1503_v23 }
 0x118   : > { %1043 = vmatmul.bf16.gmra.mxu3 %v1535_v28 }
 0x122   : > { %v556_v49 = vpop.f32.mrf.mxu0 }
 0x123   : > { %v637_v52 = vpop.f32.mrf.mxu1 }
 0x124   : > { %v638_v54 = vadd.f32 %v637_v52, %v556_v49 }
 0x126   : > { %v868_v58 = vsel %vm2543_vm10, 0.0, %v638_v54  ;;  %vm803_vm10 = vmor %vm2562_vm5, %vm2569_vm7  ;;  %vm1091_vm7 = vcmp.lt.s32.totalorder %v436_v51, %v2507_v38 }
 0x127   : > { %884 = vst [vmem:[%s2597_s21] sm:$0xff] %v868_v58  ;;  %vm2615_vm5 = vmand %vm754_vm8, %vm772_vm9  ;;  %vm720_vm8 = vcmp.lt.s32.totalorder %v437_v62, %v2467_v25  ;;  %v440_v58 = vadd.s32 %v2446_v12, %v423_v53 }
 0x128   : > { %vm2621_vm6 = vmor %vm2519_vm14, %vm803_vm10  ;;  %vm702_vm10 = vcmp.le.s32.totalorder %v2465_v24, %v437_v62 }
 0x129   : > { %vm2646_vm9 = vmand %vm1073_vm1, %vm1091_vm7 }
 0x12a   : > { %v960_v60 = vpop.f32.mrf.mxu2  ;;  %v558_v0 = vpop.f32.mrf.mxu0  ;;  %vm2658_vm2 = vmand %vm702_vm10, %vm720_vm8 }
 0x12b   : > { %v1009_v63 = vpop.f32.mrf.mxu3  ;;  %v639_v3 = vpop.f32.mrf.mxu1  ;;  %vm3518_vm1 = vmor %vm2610_vm4, %vm2615_vm5  ;;  %vm1127_vm4 = vcmp.le.s32.totalorder %v2511_v40, %v437_v62  ;;  %vm1145_vm5 = vcmp.lt.s32.totalorder %v437_v62, %v2513_v41 }
 0x12c   : > { %v1010_v2 = vadd.f32 %v1009_v63, %v960_v60  ;;  %v640_v5 = vadd.f32 %v639_v3, %v558_v0  ;;  %vm2673_vm7 = vmor %vm2519_vm14, %vm3518_vm1  ;;  %vm756_vm1 = vcmp.le.s32.totalorder %v2470_v26, %v438_v22 }
 0x12d   : > { %vm1176_vm10 = vmor %vm2646_vm9, %vm2653_vm13 }
 0x12e   : > { %v1240_v7 = vsel %vm2591_vm15, 0.0, %v1010_v2  ;;  %v869_v8 = vsel %vm2621_vm6, 0.0, %v640_v5  ;;  %vm773_vm15 = vcmp.lt.s32.totalorder %v437_v62, %v2472_v27  ;;  %vm2699_vm13 = vmand %vm1127_vm4, %vm1145_vm5  ;;  %vm1128_vm5 = vcmp.le.s32.totalorder %v2511_v40, %v438_v22 }
 0x12f   : > { %1580 = vst [vmem:[%s2597_s21 + $0x80] sm:$0xff] %v1240_v7  ;;  %vm2662_vm6 = vmand %vm755_vm3, %vm773_vm15  ;;  %vm721_vm15 = vcmp.lt.s32.totalorder %v438_v22, %v2467_v25  ;;  %v424_v7 = vadd.s32 56, %v2438_v11 }
 0x130   : > { %885 = vst [vmem:[%s2597_s21 + $0x8] sm:$0xff] %v869_v8  ;;  %vm805_vm8 = vmor %vm2658_vm2, %vm2662_vm6  ;;  %vm3525_vm2 = vnez %v3490_v48 }
 0x131   : > { %vm2692_vm3 = vmand %vm1074_vm12, %vm1092_vm0  ;;  %vm1075_vm0 = vcmp.le.s32.totalorder %v2505_v37, %v438_v22 }
 0x132   : > { %v962_v15 = vpop.f32.mrf.mxu2  ;;  %v561_v18 = vpop.f32.mrf.mxu0  ;;  %vm2707_vm9 = vmor %vm3525_vm2, %vm1176_vm10  ;;  %vm1093_vm10 = vcmp.lt.s32.totalorder %v438_v22, %v2507_v38 }
 0x133   : > { %v1011_v17 = vpop.f32.mrf.mxu3  ;;  %v642_v21 = vpop.f32.mrf.mxu1  ;;  %vm2715_vm6 = vmor %vm2519_vm14, %vm805_vm8  ;;  %vm1146_vm8 = vcmp.lt.s32.totalorder %v438_v22, %v2513_v41 }
 0x134   : > { %v1012_v20 = vadd.f32 %v1011_v17, %v962_v15  ;;  %v643_v23 = vadd.f32 %v642_v21, %v561_v18  ;;  %vm2738_vm14 = vmand %vm1075_vm0, %vm1093_vm10  ;;  %vm757_vm0 = vcmp.le.s32.totalorder %v2470_v26, %v439_v44  ;;  %v441_v18 = vadd.s32 %v2446_v12, %v424_v7 }
 0x136   : > { %v1241_v28 = vsel %vm2629_vm11, 0.0, %v1012_v20  ;;  %v870_v30 = vsel %vm2673_vm7, 0.0, %v643_v23  ;;  %vm703_vm11 = vcmp.le.s32.totalorder %v2465_v24, %v438_v22  ;;  %vm774_vm7 = vcmp.lt.s32.totalorder %v438_v22, %v2472_v27 }
 0x137   : > { %1581 = vst [vmem:[%s2597_s21 + $0x88] sm:$0xff] %v1241_v28  ;;  %vm2727_vm4 = vmand %vm703_vm11, %vm721_vm15  ;;  %v425_v28 = vadd.s32 64, %v2438_v11 }
 0x138   : > { %886 = vst [vmem:[%s2597_s21 + $0x10] sm:$0xff] %v870_v30  ;;  %vm2734_vm12 = vmand %vm756_vm1, %vm774_vm7  ;;  %vm722_vm7 = vcmp.lt.s32.totalorder %v439_v44, %v2467_v25 }
 0x139   : > { %vm2744_vm11 = vmand %vm1128_vm5, %vm1146_vm8  ;;  %vm1094_vm8 = vcmp.lt.s32.totalorder %v439_v44, %v2507_v38 }
 0x13a   : > { %v965_v35 = vpop.f32.mrf.mxu2  ;;  %v563_v39 = vpop.f32.mrf.mxu0  ;;  %vm3538_vm15 = vmor %vm2692_vm3, %vm2699_vm13  ;;  %vm775_vm3 = vcmp.lt.s32.totalorder %v439_v44, %v2472_v27 }
 0x13b   : > { %v1014_v36 = vpop.f32.mrf.mxu3  ;;  %v644_v46 = vpop.f32.mrf.mxu1  ;;  %vm2759_vm1 = vmor %vm3525_vm2, %vm3538_vm15  ;;  %vm1129_vm15 = vcmp.le.s32.totalorder %v2511_v40, %v439_v44 }
 0x13c   : > { %v1015_v45 = vadd.f32 %v1014_v36, %v965_v35  ;;  %v645_v49 = vadd.f32 %v644_v46, %v563_v39  ;;  %vm1178_vm13 = vmor %vm2738_vm14, %vm2744_vm11  ;;  %vm1076_vm14 = vcmp.le.s32.totalorder %v2505_v37, %v439_v44  ;;  %v442_v35 = vadd.s32 %v2446_v12, %v425_v28 }
 0x13d   : > { %vm2795_vm11 = vmor %vm3525_vm2, %vm1178_vm13  ;;  %vm758_vm13 = vcmp.le.s32.totalorder %v2470_v26, %v440_v58 }
 0x13e   : > { %v1242_v51 = vsel %vm2707_vm9, 0.0, %v1015_v45  ;;  %v871_v54 = vsel %vm2715_vm6, 0.0, %v645_v49  ;;  %vm704_vm9 = vcmp.le.s32.totalorder %v2465_v24, %v439_v44  ;;  %vm806_vm6 = vmor %vm2727_vm4, %vm2734_vm12  ;;  %vm3545_vm4 = vnez %v3482_v42 }
 0x13f   : > { %1582 = vst [vmem:[%s2597_s21 + $0x90] sm:$0xff] %v1242_v51  ;;  %vm2776_vm10 = vmand %vm704_vm9, %vm722_vm7  ;;  %vm1147_vm9 = vcmp.lt.s32.totalorder %v439_v44, %v2513_v41  ;;  %v426_v49 = vadd.s32 72, %v2438_v11 }
 0x140   : > { %887 = vst [vmem:[%s2597_s21 + $0x18] sm:$0xff] %v871_v54  ;;  %vm2781_vm12 = vmand %vm757_vm0, %vm775_vm3  ;;  %vm723_vm0 = vcmp.lt.s32.totalorder %v440_v58, %v2467_v25 }
 0x141   : > { %vm2787_vm5 = vmor %vm3545_vm4, %vm806_vm6  ;;  %vm705_vm6 = vcmp.le.s32.totalorder %v2465_v24, %v440_v58  ;;  %v443_v54 = vadd.s32 %v2446_v12, %v426_v49 }
 0x142   : > { %v967_v56 = vpop.f32.mrf.mxu2  ;;  %v566_v60 = vpop.f32.mrf.mxu0  ;;  %vm2812_vm3 = vmand %vm1076_vm14, %vm1094_vm8 }
 0x143   : > { %v1016_v59 = vpop.f32.mrf.mxu3  ;;  %v647_v63 = vpop.f32.mrf.mxu1  ;;  %vm2819_vm2 = vmand %vm1129_vm15, %vm1147_vm9  ;;  %vm1077_vm15 = vcmp.le.s32.totalorder %v2505_v37, %v440_v58  ;;  %vm1095_vm9 = vcmp.lt.s32.totalorder %v440_v58, %v2507_v38 }
 0x144   : > { %v1017_v62 = vadd.f32 %v1016_v59, %v967_v56  ;;  %v648_v1 = vadd.f32 %v647_v63, %v566_v60  ;;  %vm2824_vm7 = vmand %vm705_vm6, %vm723_vm0 }
 0x145   : > { %vm3558_vm14 = vmor %vm2776_vm10, %vm2781_vm12  ;;  %vm1130_vm10 = vcmp.le.s32.totalorder %v2511_v40, %v440_v58  ;;  %vm1148_vm12 = vcmp.lt.s32.totalorder %v440_v58, %v2513_v41 }
 0x146   : > { %v1243_v3 = vsel %vm2759_vm1, 0.0, %v1017_v62  ;;  %v872_v4 = vsel %vm2787_vm5, 0.0, %v648_v1  ;;  %vm776_vm1 = vcmp.lt.s32.totalorder %v440_v58, %v2472_v27  ;;  %vm2839_vm8 = vmor %vm3545_vm4, %vm3558_vm14  ;;  %vm759_vm14 = vcmp.le.s32.totalorder %v2470_v26, %v441_v18 }
 0x147   : > { %1583 = vst [vmem:[%s2597_s21 + $0x98] sm:$0xff] %v1243_v3  ;;  %vm2828_vm5 = vmand %vm758_vm13, %vm776_vm1  ;;  %vm724_vm1 = vcmp.lt.s32.totalorder %v441_v18, %v2467_v25  ;;  %v427_v3 = vadd.s32 80, %v2438_v11 }
 0x148   : > { %888 = vst [vmem:[%s2597_s21 + $0x20] sm:$0xff] %v872_v4  ;;  %vm1179_vm6 = vmor %vm2812_vm3, %vm2819_vm2 }
 0x149   : > { %vm808_vm0 = vmor %vm2824_vm7, %vm2828_vm5  ;;  %vm3565_vm7 = vnez %v3490_v48 }
 0x14a   : > { %v970_v9 = vpop.f32.mrf.mxu2  ;;  %v568_v14 = vpop.f32.mrf.mxu0  ;;  %vm2858_vm13 = vmand %vm1077_vm15, %vm1095_vm9  ;;  %vm1078_vm9 = vcmp.le.s32.totalorder %v2505_v37, %v441_v18 }
 0x14b   : > { %v1019_v13 = vpop.f32.mrf.mxu3  ;;  %v649_v17 = vpop.f32.mrf.mxu1  ;;  %vm2865_vm2 = vmand %vm1130_vm10, %vm1148_vm12  ;;  %vm1131_vm12 = vcmp.le.s32.totalorder %v2511_v40, %v441_v18 }
 0x14c   : > { %v1020_v16 = vadd.f32 %v1019_v13, %v970_v9  ;;  %v650_v19 = vadd.f32 %v649_v17, %v568_v14  ;;  %vm2873_vm3 = vmor %vm3565_vm7, %vm1179_vm6  ;;  %vm1096_vm6 = vcmp.lt.s32.totalorder %v441_v18, %v2507_v38  ;;  %v444_v14 = vadd.s32 %v2446_v12, %v427_v3 }
 0x14d   : > { %vm2881_vm5 = vmor %vm3545_vm4, %vm808_vm0  ;;  %vm1149_vm0 = vcmp.lt.s32.totalorder %v441_v18, %v2513_v41 }
 0x14e   : > { %v1244_v20 = vsel %vm2795_vm11, 0.0, %v1020_v16  ;;  %v873_v22 = vsel %vm2839_vm8, 0.0, %v650_v19  ;;  %vm706_vm11 = vcmp.le.s32.totalorder %v2465_v24, %v441_v18  ;;  %vm777_vm8 = vcmp.lt.s32.totalorder %v441_v18, %v2472_v27  ;;  %vm2904_vm4 = vmand %vm1078_vm9, %vm1096_vm6 }
 0x14f   : > { %1584 = vst [vmem:[%s2597_s21 + $0xa0] sm:$0xff] %v1244_v20  ;;  %vm2893_vm10 = vmand %vm706_vm11, %vm724_vm1  ;;  %vm760_vm9 = vcmp.le.s32.totalorder %v2470_v26, %v442_v35  ;;  %v428_v20 = vadd.s32 88, %v2438_v11 }
 0x150   : > { %889 = vst [vmem:[%s2597_s21 + $0x28] sm:$0xff] %v873_v22  ;;  %vm2900_vm15 = vmand %vm759_vm14, %vm777_vm8  ;;  %vm725_vm8 = vcmp.lt.s32.totalorder %v442_v35, %v2467_v25 }
 0x151   : > { %vm2910_vm11 = vmand %vm1131_vm12, %vm1149_vm0  ;;  %vm1097_vm0 = vcmp.lt.s32.totalorder %v442_v35, %v2507_v38 }
 0x152   : > { %v972_v31 = vpop.f32.mrf.mxu2  ;;  %v571_v33 = vpop.f32.mrf.mxu0  ;;  %vm3578_vm1 = vmor %vm2858_vm13, %vm2865_vm2  ;;  %vm778_vm13 = vcmp.lt.s32.totalorder %v442_v35, %v2472_v27 }
 0x153   : > { %v1021_v32 = vpop.f32.mrf.mxu3  ;;  %v652_v39 = vpop.f32.mrf.mxu1  ;;  %vm2925_vm14 = vmor %vm3565_vm7, %vm3578_vm1  ;;  %vm1132_vm1 = vcmp.le.s32.totalorder %v2511_v40, %v442_v35 }
 0x154   : > { %v1022_v36 = vadd.f32 %v1021_v32, %v972_v31  ;;  %v653_v44 = vadd.f32 %v652_v39, %v571_v33  ;;  %vm1181_vm2 = vmor %vm2904_vm4, %vm2910_vm11  ;;  %vm1079_vm4 = vcmp.le.s32.totalorder %v2505_v37, %v442_v35  ;;  %v445_v31 = vadd.s32 %v2446_v12, %v428_v20 }
 0x155   : > { %vm2961_vm11 = vmor %vm3565_vm7, %vm1181_vm2  ;;  %vm761_vm2 = vcmp.le.s32.totalorder %v2470_v26, %v443_v54 }
 0x156   : > { %v1245_v46 = vsel %vm2873_vm3, 0.0, %v1022_v36  ;;  %v874_v50 = vsel %vm2881_vm5, 0.0, %v653_v44  ;;  %vm707_vm3 = vcmp.le.s32.totalorder %v2465_v24, %v442_v35  ;;  %vm809_vm5 = vmor %vm2893_vm10, %vm2900_vm15  ;;  %vm3585_vm10 = vnez %v3482_v42 }
 0x157   : > { %1585 = vst [vmem:[%s2597_s21 + $0xa8] sm:$0xff] %v1245_v46  ;;  %vm2942_vm6 = vmand %vm707_vm3, %vm725_vm8  ;;  %vm1150_vm3 = vcmp.lt.s32.totalorder %v442_v35, %v2513_v41  ;;  %v429_v44 = vadd.s32 96, %v2438_v11 }
 0x158   : > { %890 = vst [vmem:[%s2597_s21 + $0x30] sm:$0xff] %v874_v50  ;;  %vm2947_vm15 = vmand %vm760_vm9, %vm778_vm13  ;;  %vm726_vm9 = vcmp.lt.s32.totalorder %v443_v54, %v2467_v25 }
 0x159   : > { %vm2953_vm12 = vmor %vm3585_vm10, %vm809_vm5  ;;  %vm708_vm5 = vcmp.le.s32.totalorder %v2465_v24, %v443_v54  ;;  %v446_v50 = vadd.s32 %v2446_v12, %v429_v44 }
 0x15a   : > { %v975_v52 = vpop.f32.mrf.mxu2  ;;  %v573_v56 = vpop.f32.mrf.mxu0  ;;  %vm2978_vm13 = vmand %vm1079_vm4, %vm1097_vm0 }
 0x15b   : > { %v1024_v55 = vpop.f32.mrf.mxu3  ;;  %v654_v59 = vpop.f32.mrf.mxu1  ;;  %vm2985_vm7 = vmand %vm1132_vm1, %vm1150_vm3  ;;  %vm1080_vm1 = vcmp.le.s32.totalorder %v2505_v37, %v443_v54  ;;  %vm1098_vm3 = vcmp.lt.s32.totalorder %v443_v54, %v2507_v38 }
 0x15c   : > { %v1025_v58 = vadd.f32 %v1024_v55, %v975_v52  ;;  %v655_v61 = vadd.f32 %v654_v59, %v573_v56  ;;  %vm2990_vm8 = vmand %vm708_vm5, %vm726_vm9 }
 0x15d   : > { %vm3598_vm4 = vmor %vm2942_vm6, %vm2947_vm15  ;;  %vm1133_vm6 = vcmp.le.s32.totalorder %v2511_v40, %v443_v54  ;;  %vm1151_vm15 = vcmp.lt.s32.totalorder %v443_v54, %v2513_v41 }
 0x15e   : > { %v1246_v63 = vsel %vm2925_vm14, 0.0, %v1025_v58  ;;  %v875_v0 = vsel %vm2953_vm12, 0.0, %v655_v61  ;;  %vm779_vm14 = vcmp.lt.s32.totalorder %v443_v54, %v2472_v27  ;;  %vm3005_vm0 = vmor %vm3585_vm10, %vm3598_vm4  ;;  %vm762_vm4 = vcmp.le.s32.totalorder %v2470_v26, %v444_v14 }
 0x15f   : > { %1586 = vst [vmem:[%s2597_s21 + $0xb0] sm:$0xff] %v1246_v63  ;;  %vm2994_vm12 = vmand %vm761_vm2, %vm779_vm14  ;;  %vm727_vm14 = vcmp.lt.s32.totalorder %v444_v14, %v2467_v25  ;;  %v430_v63 = vadd.s32 104, %v2438_v11 }
 0x160   : > { %891 = vst [vmem:[%s2597_s21 + $0x38] sm:$0xff] %v875_v0  ;;  %vm1182_vm5 = vmor %vm2978_vm13, %vm2985_vm7 }
 0x161   : > { %vm811_vm9 = vmor %vm2990_vm8, %vm2994_vm12  ;;  %vm3605_vm8 = vnez %v3490_v48 }
 0x162   : > { %v977_v5 = vpop.f32.mrf.mxu2  ;;  %v576_v8 = vpop.f32.mrf.mxu0  ;;  %vm3024_vm2 = vmand %vm1080_vm1, %vm1098_vm3  ;;  %vm1081_vm3 = vcmp.le.s32.totalorder %v2505_v37, %v444_v14 }
 0x163   : > { %v1026_v7 = vpop.f32.mrf.mxu3  ;;  %v657_v13 = vpop.f32.mrf.mxu1  ;;  %vm3031_vm7 = vmand %vm1133_vm6, %vm1151_vm15  ;;  %vm1134_vm15 = vcmp.le.s32.totalorder %v2511_v40, %v444_v14 }
 0x164   : > { %v1027_v10 = vadd.f32 %v1026_v7, %v977_v5  ;;  %v658_v15 = vadd.f32 %v657_v13, %v576_v8  ;;  %vm3039_vm13 = vmor %vm3605_vm8, %vm1182_vm5  ;;  %vm1099_vm5 = vcmp.lt.s32.totalorder %v444_v14, %v2507_v38  ;;  %v447_v8 = vadd.s32 %v2446_v12, %v430_v63 }
 0x165   : > { %vm3047_vm12 = vmor %vm3585_vm10, %vm811_vm9  ;;  %vm1152_vm9 = vcmp.lt.s32.totalorder %v444_v14, %v2513_v41 }
 0x166   : > { %v1247_v16 = vsel %vm2961_vm11, 0.0, %v1027_v10  ;;  %v876_v18 = vsel %vm3005_vm0, 0.0, %v658_v15  ;;  %vm709_vm11 = vcmp.le.s32.totalorder %v2465_v24, %v444_v14  ;;  %vm780_vm0 = vcmp.lt.s32.totalorder %v444_v14, %v2472_v27  ;;  %vm3070_vm10 = vmand %vm1081_vm3, %vm1099_vm5 }
 0x167   : > { %1587 = vst [vmem:[%s2597_s21 + $0xb8] sm:$0xff] %v1247_v16  ;;  %vm3059_vm6 = vmand %vm709_vm11, %vm727_vm14  ;;  %vm763_vm3 = vcmp.le.s32.totalorder %v2470_v26, %v445_v31  ;;  %v431_v16 = vadd.s32 112, %v2438_v11 }
 0x168   : > { %892 = vst [vmem:[%s2597_s21 + $0x40] sm:$0xff] %v876_v18  ;;  %vm3066_vm1 = vmand %vm762_vm4, %vm780_vm0  ;;  %vm728_vm0 = vcmp.lt.s32.totalorder %v445_v31, %v2467_v25 }
 0x169   : > { %vm3076_vm11 = vmand %vm1134_vm15, %vm1152_vm9  ;;  %vm1100_vm9 = vcmp.lt.s32.totalorder %v445_v31, %v2507_v38 }
 0x16a   : > { %v980_v23 = vpop.f32.mrf.mxu2  ;;  %v578_v29 = vpop.f32.mrf.mxu0  ;;  %vm3618_vm14 = vmor %vm3024_vm2, %vm3031_vm7  ;;  %vm781_vm2 = vcmp.lt.s32.totalorder %v445_v31, %v2472_v27 }
 0x16b   : > { %v1029_v28 = vpop.f32.mrf.mxu3  ;;  %v659_v33 = vpop.f32.mrf.mxu1  ;;  %vm3091_vm4 = vmor %vm3605_vm8, %vm3618_vm14  ;;  %vm1135_vm14 = vcmp.le.s32.totalorder %v2511_v40, %v445_v31 }
 0x16c   : > { %v1030_v32 = vadd.f32 %v1029_v28, %v980_v23  ;;  %v660_v35 = vadd.f32 %v659_v33, %v578_v29  ;;  %vm1184_vm7 = vmor %vm3070_vm10, %vm3076_vm11  ;;  %vm1082_vm10 = vcmp.le.s32.totalorder %v2505_v37, %v445_v31  ;;  %v448_v23 = vadd.s32 %v2446_v12, %v431_v16 }
 0x16d   : > { %vm3127_vm11 = vmor %vm3605_vm8, %vm1184_vm7  ;;  %vm764_vm7 = vcmp.le.s32.totalorder %v2470_v26, %v446_v50 }
 0x16e   : > { %v1248_v39 = vsel %vm3039_vm13, 0.0, %v1030_v32  ;;  %v877_v45 = vsel %vm3047_vm12, 0.0, %v660_v35  ;;  %vm710_vm13 = vcmp.le.s32.totalorder %v2465_v24, %v445_v31  ;;  %vm812_vm12 = vmor %vm3059_vm6, %vm3066_vm1  ;;  %vm3625_vm6 = vnez %v3482_v42 }
 0x16f   : > { %1588 = vst [vmem:[%s2597_s21 + $0xc0] sm:$0xff] %v1248_v39  ;;  %vm3108_vm5 = vmand %vm710_vm13, %vm728_vm0  ;;  %vm1153_vm13 = vcmp.lt.s32.totalorder %v445_v31, %v2513_v41  ;;  %v432_v39 = vadd.s32 120, %v2438_v11 }
 0x170   : > { %893 = vst [vmem:[%s2597_s21 + $0x48] sm:$0xff] %v877_v45  ;;  %vm3113_vm1 = vmand %vm763_vm3, %vm781_vm2  ;;  %vm729_vm3 = vcmp.lt.s32.totalorder %v446_v50, %v2467_v25 }
 0x171   : > { %vm3119_vm15 = vmor %vm3625_vm6, %vm812_vm12  ;;  %vm711_vm12 = vcmp.le.s32.totalorder %v2465_v24, %v446_v50 }
 0x172   : > { %v982_v47 = vpop.f32.mrf.mxu2  ;;  %v581_v52 = vpop.f32.mrf.mxu0  ;;  %vm3144_vm2 = vmand %vm1082_vm10, %vm1100_vm9 }
 0x173   : > { %v1031_v51 = vpop.f32.mrf.mxu3  ;;  %v662_v55 = vpop.f32.mrf.mxu1  ;;  %vm3151_vm8 = vmand %vm1135_vm14, %vm1153_vm13  ;;  %vm1083_vm14 = vcmp.le.s32.totalorder %v2505_v37, %v446_v50  ;;  %vm1101_vm13 = vcmp.lt.s32.totalorder %v446_v50, %v2507_v38 }
 0x174   : > { %v1032_v54 = vadd.f32 %v1031_v51, %v982_v47  ;;  %v663_v57 = vadd.f32 %v662_v55, %v581_v52  ;;  %vm3156_vm0 = vmand %vm711_vm12, %vm729_vm3  ;;  %v449_v51 = vadd.s32 %v2446_v12, %v432_v39 }
 0x175   : > { %vm3638_vm10 = vmor %vm3108_vm5, %vm3113_vm1  ;;  %vm1136_vm5 = vcmp.le.s32.totalorder %v2511_v40, %v446_v50  ;;  %vm1154_vm1 = vcmp.lt.s32.totalorder %v446_v50, %v2513_v41 }
 0x176   : > { %v1249_v59 = vsel %vm3091_vm4, 0.0, %v1032_v54  ;;  %v878_v60 = vsel %vm3119_vm15, 0.0, %v663_v57  ;;  %vm782_vm4 = vcmp.lt.s32.totalorder %v446_v50, %v2472_v27  ;;  %vm3171_vm9 = vmor %vm3625_vm6, %vm3638_vm10  ;;  %vm765_vm10 = vcmp.le.s32.totalorder %v2470_v26, %v447_v8 }
 0x177   : > { %1589 = vst [vmem:[%s2597_s21 + $0xc8] sm:$0xff] %v1249_v59  ;;  %vm3160_vm15 = vmand %vm764_vm7, %vm782_vm4  ;;  %vm730_vm4 = vcmp.lt.s32.totalorder %v447_v8, %v2467_v25 }
 0x178   : > { %894 = vst [vmem:[%s2597_s21 + $0x50] sm:$0xff] %v878_v60  ;;  %vm1185_vm12 = vmor %vm3144_vm2, %vm3151_vm8 }
 0x179   : > { %vm814_vm3 = vmor %vm3156_vm0, %vm3160_vm15  ;;  %vm3645_vm0 = vnez %v3490_v48 }
 0x17a   : > { %v985_v1 = vpop.f32.mrf.mxu2  ;;  %v583_v4 = vpop.f32.mrf.mxu0  ;;  %vm3190_vm7 = vmand %vm1083_vm14, %vm1101_vm13 }
 0x17b   : > { %v1034_v3 = vpop.f32.mrf.mxu3  ;;  %v664_v7 = vpop.f32.mrf.mxu1  ;;  %vm3197_vm8 = vmand %vm1136_vm5, %vm1154_vm1  ;;  %vm1084_vm5 = vcmp.le.s32.totalorder %v2505_v37, %v447_v8  ;;  %vm1102_vm1 = vcmp.lt.s32.totalorder %v447_v8, %v2507_v38 }
 0x17c   : > { %v1035_v6 = vadd.f32 %v1034_v3, %v985_v1  ;;  %v665_v9 = vadd.f32 %v664_v7, %v583_v4  ;;  %vm3205_vm2 = vmor %vm3645_vm0, %vm1185_vm12 }
 0x17d   : > { %vm3213_vm15 = vmor %vm3625_vm6, %vm814_vm3 }
 0x17e   : > { %v1250_v10 = vsel %vm3127_vm11, 0.0, %v1035_v6  ;;  %v879_v14 = vsel %vm3171_vm9, 0.0, %v665_v9  ;;  %vm712_vm11 = vcmp.le.s32.totalorder %v2465_v24, %v447_v8  ;;  %vm783_vm9 = vcmp.lt.s32.totalorder %v447_v8, %v2472_v27  ;;  %vm1186_vm14 = vmor %vm3190_vm7, %vm3197_vm8 }
 0x17f   : > { %1590 = vst [vmem:[%s2597_s21 + $0xd0] sm:$0xff] %v1250_v10  ;;  %vm3223_vm13 = vmand %vm712_vm11, %vm730_vm4  ;;  %vm1137_vm7 = vcmp.le.s32.totalorder %v2511_v40, %v447_v8  ;;  %vm1155_vm8 = vcmp.lt.s32.totalorder %v447_v8, %v2513_v41  ;;  %vm731_vm4 = vcmp.lt.s32.totalorder %v448_v23, %v2467_v25 }
 0x180   : > { %895 = vst [vmem:[%s2597_s21 + $0x58] sm:$0xff] %v879_v14  ;;  %vm3228_vm12 = vmand %vm765_vm10, %vm783_vm9  ;;  %vm766_vm9 = vcmp.le.s32.totalorder %v2470_v26, %v448_v23 }
 0x181   : > { %vm3238_vm3 = vmor %vm3645_vm0, %vm1186_vm14  ;;  %vm784_vm14 = vcmp.lt.s32.totalorder %v448_v23, %v2472_v27 }
 0x182   : > { %v987_v19 = vpop.f32.mrf.mxu2  ;;  %v586_v21 = vpop.f32.mrf.mxu0  ;;  %vm3254_vm10 = vmand %vm1084_vm5, %vm1102_vm1 }
 0x183   : > { %v1036_v20 = vpop.f32.mrf.mxu3  ;;  %v667_v29 = vpop.f32.mrf.mxu1  ;;  %vm3269_vm5 = vmand %vm766_vm9, %vm784_vm14  ;;  %vm714_vm9 = vcmp.le.s32.totalorder %v2465_v24, %v449_v51  ;;  %vm732_vm14 = vcmp.lt.s32.totalorder %v449_v51, %v2467_v25 }
 0x184   : > { %v1037_v28 = vadd.f32 %v1036_v20, %v987_v19  ;;  %v668_v31 = vadd.f32 %v667_v29, %v586_v21  ;;  %vm3664_vm1 = vmor %vm3223_vm13, %vm3228_vm12  ;;  %vm1085_vm13 = vcmp.le.s32.totalorder %v2505_v37, %v448_v23  ;;  %vm1103_vm12 = vcmp.lt.s32.totalorder %v448_v23, %v2507_v38 }
 0x186   : > { %v1251_v32 = vsel %vm3205_vm2, 0.0, %v1037_v28  ;;  %v880_v34 = vsel %vm3213_vm15, 0.0, %v668_v31  ;;  %vm713_vm2 = vcmp.le.s32.totalorder %v2465_v24, %v448_v23  ;;  %vm3260_vm15 = vmand %vm1137_vm7, %vm1155_vm8 }
 0x187   : > { %1591 = vst [vmem:[%s2597_s21 + $0xd8] sm:$0xff] %v1251_v32  ;;  %vm3265_vm11 = vmand %vm713_vm2, %vm731_vm4 }
 0x188   : > { %896 = vst [vmem:[%s2597_s21 + $0x60] sm:$0xff] %v880_v34  ;;  %vm865_vm7 = vmor %vm3625_vm6, %vm3664_vm1  ;;  %vm785_vm1 = vcmp.lt.s32.totalorder %v449_v51, %v2472_v27 }
 0x189   : > { %vm1187_vm8 = vmor %vm3254_vm10, %vm3260_vm15  ;;  %vm1156_vm10 = vcmp.lt.s32.totalorder %v448_v23, %v2513_v41 }
 0x18a   : > { %v990_v43 = vpop.f32.mrf.mxu2  ;;  %v588_v46 = vpop.f32.mrf.mxu0  ;;  %vm816_vm2 = vmor %vm3265_vm11, %vm3269_vm5  ;;  %vm767_vm5 = vcmp.le.s32.totalorder %v2470_v26, %v449_v51 }
 0x18b   : > { %v1039_v45 = vpop.f32.mrf.mxu3  ;;  %v669_v50 = vpop.f32.mrf.mxu1  ;;  %vm3297_vm4 = vmor %vm3645_vm0, %vm1187_vm8 }
 0x18c   : > { %v1040_v49 = vadd.f32 %v1039_v45, %v990_v43  ;;  %v670_v11 = vadd.f32 %v669_v50, %v588_v46  ;;  %vm3305_vm11 = vmor %vm3625_vm6, %vm816_vm2 }
 0x18d   : > { %vm3311_vm15 = vmand %vm1085_vm13, %vm1103_vm12 }
 0x18e   : > { %v1252_v52 = vsel %vm3238_vm3, 0.0, %v1040_v49  ;;  %v881_v53 = vsel %vm865_vm7, 0.0, %v670_v11  ;;  %vm1138_vm3 = vcmp.le.s32.totalorder %v2511_v40, %v448_v23  ;;  %vm3321_vm8 = vmand %vm714_vm9, %vm732_vm14  ;;  %vm1157_vm9 = vcmp.lt.s32.totalorder %v449_v51, %v2513_v41 }
 0x18f   : > { %1592 = vst [vmem:[%s2597_s21 + $0xe0] sm:$0xff] %v1252_v52  ;;  %vm3317_vm7 = vmand %vm1138_vm3, %vm1156_vm10  ;;  %vm1086_vm3 = vcmp.le.s32.totalorder %v2505_v37, %v449_v51 }
 0x190   : > { %897 = vst [vmem:[%s2597_s21 + $0x68] sm:$0xff] %v881_v53  ;;  %vm3325_vm2 = vmand %vm767_vm5, %vm785_vm1 }
 0x191   : > { %vm1188_vm13 = vmor %vm3311_vm15, %vm3317_vm7 }
 0x192   : > { %v992_v55 = vpop.f32.mrf.mxu2  ;;  %v591_v58 = vpop.f32.mrf.mxu0  ;;  %vm817_vm12 = vmor %vm3321_vm8, %vm3325_vm2 }
 0x193   : > { %v1041_v57 = vpop.f32.mrf.mxu3  ;;  %v672_v24 = vpop.f32.mrf.mxu1  ;;  %vm1238_vm10 = vmor %vm3645_vm0, %vm1188_vm13 }
 0x194   : > { %v1042_v60 = vadd.f32 %v1041_v57, %v992_v55  ;;  %v673_v61 = vadd.f32 %v672_v24, %v591_v58  ;;  %vm867_vm14 = vmor %vm3625_vm6, %vm817_vm12 }
 0x196   : > { %v1253_v26 = vsel %vm3297_vm4, 0.0, %v1042_v60  ;;  %v882_v27 = vsel %vm3305_vm11, 0.0, %v673_v61  ;;  %vm1104_vm4 = vcmp.lt.s32.totalorder %v449_v51, %v2507_v38  ;;  %vm1139_vm11 = vcmp.le.s32.totalorder %v2511_v40, %v449_v51 }
 0x197   : > { %1593 = vst [vmem:[%s2597_s21 + $0xe8] sm:$0xff] %v1253_v26  ;;  %vm1120_vm15 = vmand %vm1086_vm3, %vm1104_vm4 }
 0x198   : > { %898 = vst [vmem:[%s2597_s21 + $0x70] sm:$0xff] %v882_v27  ;;  %vm1173_vm5 = vmand %vm1139_vm11, %vm1157_vm9 }
 0x199   : > { %vm1189_vm1 = vmor %vm1120_vm15, %vm1173_vm5 }
 0x19a   : > { %v995_v63 = vpop.f32.mrf.mxu2  ;;  %v593_v1 = vpop.f32.mrf.mxu0  ;;  %vm1239_vm7 = vmor %vm3645_vm0, %vm1189_vm1 }
 0x19b   : > { %v1044_v0 = vpop.f32.mrf.mxu3  ;;  %v674_v37 = vpop.f32.mrf.mxu1 }
 0x19c   : > { %v1045_v2 = vadd.f32 %v1044_v0, %v995_v63  ;;  %v675_v38 = vadd.f32 %v674_v37, %v593_v1 }
 0x19e   : > { %v1254_v3 = vsel %vm1238_vm10, 0.0, %v1045_v2  ;;  %v883_v4 = vsel %vm867_vm14, 0.0, %v675_v38 }
 0x19f   : > { %1594 = vst [vmem:[%s2597_s21 + $0xf0] sm:$0xff] %v1254_v3 }
 0x1a0   : > { %899 = vst [vmem:[%s2597_s21 + $0x78] sm:$0xff] %v883_v4 }
 0x1a2   : > { %v997_v40 = vpop.f32.mrf.mxu2 }
 0x1a3   : > { %v1046_v5 = vpop.f32.mrf.mxu3 }
 0x1a4   : > { %v1047_v41 = vadd.f32 %v1046_v5, %v997_v40 }
 0x1a6   : > { %v1255_v42 = vsel %vm1239_vm7, 0.0, %v1047_v41 }
 0x1a7   : > { %1595 = vst [vmem:[%s2597_s21 + $0xf8] sm:$0xff] %v1255_v42 }
 0x1a8   : > { %s3677_s1 = sld [smem:[#allocation42_spill]]  ;;  %s1299_s19 = sshll.u32 %s2597_s21, 4  ;;  %s1300_s19 = int_to_ptr.vmem [resolvable:$true] %s1299_s19 }
 0x1a9   : > { %s2001_s26 = smov 2048   ;;  %s2002_s12 = smov 4096  }
 0x1aa   : > { %1645 = sst [smem:[#allocation20]] (%p2209_p3), %s2001_s26  ;;  %s2003_s28 = smov 16  }
 0x1ab   : > { %1646 = sst [smem:[#allocation20 + $0x1]] (%p2209_p3), %s2002_s12  ;;  %s2004_s24 = smov 128  }
 0x1ac   : > { %1647 = sst [smem:[#allocation20 + $0x2]] (%p2209_p3), %s2003_s28  ;;  %s2005_s15 = smov 8  }
 0x1ad   : > { %1648 = sst [smem:[#allocation20 + $0x3]] (%p2209_p3), %s2004_s24  ;;  %s2007_s2 = smov 0  }
 0x1ae   : > { %s1288_s17 = scalar_lea.hbm %s3677_s1, %s1471_s11  ;;  %1649 = sst [smem:[#allocation20 + $0x4]] (%p2209_p3), %s2004_s24 }
 0x1af   : > { %s1301_s0 = sshll.u32 %s1288_s17, 4  ;;  %1650 = sst [smem:[#allocation20 + $0x5]] (%p2209_p3), %s2005_s15  ;;  %s1302_s0 = int_to_ptr.hbm [resolvable:$true] %s1301_s0 }
 0x1b0   : > { %s2006_s11 = smov [#allocation19]  }
 0x1b1   : > { %1651 = dma.general (%p2209_p3), %s1300_s19, 4096, %s1302_s0, %s1274_s14, %s2006_s11, [#allocation20], %s2007_s2, 0  }
 0x1b2 PF: > { %s3678_s18 = sld [smem:[#allocation30_spill]]  ;;  %p1654_p0 = pnand %p1452_p5, %p2217_p7 }
 0x1b4   : > { %p1655_p6 = pneg %p1654_p0 }
 0x1b8   : > { %s1329_s29 = sand.u32 1, %s3678_s18  }
 0x1b9   : > { %s1330_s16 = scalar_lea.sflag [#allocation10], %s1329_s29 }
 0x1ba   : > { %1931 = dma.done.wait (%p1655_p6), %s1330_s16, 4096  }
 0x1bb   : > { %1933 = vsyncadd (%p1655_p6), %s1330_s16, 4294963200  ;;  %s55_s9 = sadd.s32 1, %s1980_s9   ;;  %s3680_s13 = sld [smem:[#allocation38_spill]] }
 0x1bc   : > { %p52_p8 = scmp.ge.s32.totalorder %s55_s9, 4   ;;  %s3681_s8 = sld [smem:[#allocation36_spill]] }
 0x1bd   : > { %s3682_s7 = sld [smem:[#allocation31_spill]]  ;;  %s3686_s2 = smov %s1940_s3 }
 0x1be   : > { %s3683_s28 = sld [smem:[#allocation35_spill]]  ;;  %s3687_s3 = smov %s1944_s23 }
 0x1bf   : > { %s3684_s29 = sld [smem:[#allocation33_spill]]  ;;  %s3689_s24 = smov %s1952_s4 }
 0x1c0   : > { %s3685_s30 = sld [smem:[#allocation34_spill]]  ;;  %s3690_s4 = smov %s1956_s25 }
 0x1c1   : > { %s3688_s23 = smov %s3680_s13  ;;  %s3692_s26 = smov %s1964_s27 }
 0x1c2   : > { %s3691_s25 = smov %s3681_s8  ;;  %54 = sbr.rel (!%p52_p8) target bundleno = 26 (0x1a), region = 119 }
 0x1c3   : > { %s3693_s27 = smov %s3682_s7 }
 0x1c7   :  { %1336 = vsyncpa [#allocation9], 1 }
 0x1c8   :  { %1338 = vsyncpa [#allocation9 + $0x1], 1 }
 0x1c9   :  { %1339 = vsyncpa [#allocation12], 1 }
 0x1ca   :  { %1341 = vsyncpa [#allocation12 + $0x1], 1 }
 0x1cb   :  { %1342 = vsyncpa [#allocation10], 1 }
 0x1cc   :  { %1344 = vsyncpa [#allocation10 + $0x1], 1 }

</bundles_post_ra>
